<compile_context>
chip_gen: v7x
topology: tpu7x:2x2x1
jax: 0.10.0
libtpu: 0.0.40
codegen_flags: <defaults>
</compile_context>

<pallas_src>
import jax
import jax.numpy as jnp
from jax.experimental import pallas as pl
from jax.experimental.pallas import tpu as pltpu


def _round_up(x, m):
    return (x + m - 1) // m * m


def _actor_critic_kernel(x_ref, w1_ref, b1_ref, w2_ref, b2_ref,
                         wh_ref, bh_ref, out_ref):
    """Fused shared trunk + fused (policy | value) head.

    Matmul operands are bf16, accumulation is f32; bias add + ReLU stay f32.
    The single head matmul writes a lane-dense (TB, 128) output block.
    """
    x = x_ref[...].astype(jnp.bfloat16)

    h1 = jnp.dot(x, w1_ref[...], preferred_element_type=jnp.float32) + b1_ref[...]
    h1 = jnp.maximum(h1, 0.0)

    h2 = jnp.dot(h1.astype(jnp.bfloat16), w2_ref[...],
                 preferred_element_type=jnp.float32) + b2_ref[...]
    h2 = jnp.maximum(h2, 0.0)

    out_ref[...] = (
        jnp.dot(h2.astype(jnp.bfloat16), wh_ref[...],
                preferred_element_type=jnp.float32) + bh_ref[...]
    )


def init_params(key, state_size, action_size, hidden_size=256):
    """PyTorch nn.Linear-style init (U(-k, k), k = 1/sqrt(fan_in)).

    Weights stored already transposed: (in_features, out_features);
    biases as (1, out_features).
    """
    def linear(k, fan_in, fan_out):
        kw, kb = jax.random.split(k)
        bound = 1.0 / jnp.sqrt(fan_in)
        w = jax.random.uniform(kw, (fan_in, fan_out), jnp.float32, -bound, bound)
        b = jax.random.uniform(kb, (1, fan_out), jnp.float32, -bound, bound)
        return w, b

    k1, k2, k3, k4 = jax.random.split(key, 4)
    w1, b1 = linear(k1, state_size, hidden_size)
    w2, b2 = linear(k2, hidden_size, hidden_size)
    wp, bp = linear(k3, hidden_size, action_size)
    wv, bv = linear(k4, hidden_size, 1)
    return (w1, b1, w2, b2, wp, bp, wv, bv)


def prepare_params(params, action_size):
    """One-time conversion: fuse policy/value heads, pad head out-dim to 128
    lanes, cast weights to bf16 (biases stay f32)."""
    w1, b1, w2, b2, wp, bp, wv, bv = params
    hidden = w1.shape[1]
    head_cols = action_size + 1
    out_pad = _round_up(head_cols, 128)

    wh = jnp.zeros((hidden, out_pad), jnp.float32)
    wh = wh.at[:, :action_size].set(wp).at[:, action_size:head_cols].set(wv)
    bh = jnp.zeros((1, out_pad), jnp.float32)
    bh = bh.at[:, :action_size].set(bp.reshape(1, -1))
    bh = bh.at[:, action_size:head_cols].set(bv.reshape(1, -1))

    return (w1.astype(jnp.bfloat16), b1.astype(jnp.float32),
            w2.astype(jnp.bfloat16), b2.astype(jnp.float32),
            wh.astype(jnp.bfloat16), bh.astype(jnp.float32))


def actor_critic_forward(x, prepared, state_size, action_size, block_batch=512):
    """Reproduces ActorCritic.forward: returns (policy_logits (B, A), value (B, 1))."""
    x = jnp.asarray(x, jnp.float32)
    if x.ndim == 1:
        x = x[None, :]                       # unsqueeze(0)

    # pad / truncate the feature axis to state_size (glue, plain JAX)
    b, s = x.shape
    if s < state_size:
        x = jnp.concatenate([x, jnp.zeros((b, state_size - s), jnp.float32)], axis=1)
    elif s > state_size:
        x = x[:, :state_size]

    w1, b1, w2, b2, wh, bh = prepared
    hidden = w1.shape[1]
    out_pad = wh.shape[1]

    # batch tiling: TB multiple of 8, pad batch up to a multiple of TB
    tb = min(block_batch, _round_up(b, 8))
    b_pad = _round_up(b, tb)
    if b_pad != b:
        x = jnp.concatenate(
            [x, jnp.zeros((b_pad - b, state_size), jnp.float32)], axis=0)
    n_blocks = b_pad // tb

    # weights/biases: full-array blocks, block index fixed at 0 -> VMEM-resident
    def resident(arr):
        nd = arr.ndim
        return pl.BlockSpec(arr.shape, lambda i, _nd=nd: (0,) * _nd)

    flops = 2 * b_pad * (state_size * hidden + hidden * hidden + hidden * out_pad)
    bytes_accessed = (x.size * 4
                      + w1.size * 2 + w2.size * 2 + wh.size * 2
                      + b1.size * 4 + b2.size * 4 + bh.size * 4
                      + b_pad * out_pad * 4)

    out = pl.pallas_call(
        _actor_critic_kernel,
        grid=(n_blocks,),
        in_specs=[
            pl.BlockSpec((tb, state_size), lambda i: (i, 0)),
            resident(w1), resident(b1),
            resident(w2), resident(b2),
            resident(wh), resident(bh),
        ],
        out_specs=pl.BlockSpec((tb, out_pad), lambda i: (i, 0)),
        out_shape=jax.ShapeDtypeStruct((b_pad, out_pad), jnp.float32),
        compiler_params=pltpu.CompilerParams(
            dimension_semantics=("parallel",)),
        cost_estimate=pl.CostEstimate(
            flops=flops, transcendentals=0, bytes_accessed=bytes_accessed),
    )(x, w1, b1, w2, b2, wh, bh)

    policy = out[:b, :action_size]
    value = out[:b, action_size:action_size + 1]
    return policy, value


def _reference_forward(x, params):
    """Pure-JAX f32 reference for a sanity check."""
    w1, b1, w2, b2, wp, bp, wv, bv = params
    h = jnp.maximum(x @ w1 + b1, 0.0)
    h = jnp.maximum(h @ w2 + b2, 0.0)
    return h @ wp + bp, h @ wv + bv


if __name__ == "__main__":
    # TODO(synk): PyTorch module's try/except zero-output fallback and the
    # host-side "Padding state" warning print are host control flow, not kernel
    # work; only the numeric forward path is implemented here.
    STATE_SIZE = 16
    ACTION_SIZE = 8
    HIDDEN = 256
    BATCH = 256

    key = jax.random.PRNGKey(0)
    kp, kx = jax.random.split(key)
    params = init_params(kp, STATE_SIZE, ACTION_SIZE, HIDDEN)
    prepared = prepare_params(params, ACTION_SIZE)

    x = jax.random.normal(kx, (BATCH, STATE_SIZE), jnp.float32)

    # default path: single fat batch tile
    policy, value = actor_critic_forward(x, prepared, STATE_SIZE, ACTION_SIZE)
    jax.block_until_ready((policy, value))

    # correctness vs f32 reference (bf16 matmul operands => loosened tolerance)
    ref_policy, ref_value = _reference_forward(x, params)
    assert policy.shape == (BATCH, ACTION_SIZE)
    assert value.shape == (BATCH, 1)
    assert jnp.allclose(policy, ref_policy, atol=2e-2, rtol=2e-2), "policy mismatch"
    assert jnp.allclose(value, ref_value, atol=2e-2, rtol=2e-2), "value mismatch"

    # multi-tile grid path (block_batch=128 -> 2 grid steps, double-buffered DMA)
    p_mt, v_mt = actor_critic_forward(x, prepared, STATE_SIZE, ACTION_SIZE,
                                      block_batch=128)
    jax.block_until_ready((p_mt, v_mt))
    assert jnp.allclose(p_mt, ref_policy, atol=2e-2, rtol=2e-2), "multi-tile policy mismatch"
    assert jnp.allclose(v_mt, ref_value, atol=2e-2, rtol=2e-2), "multi-tile value mismatch"

    # also exercise the 1-D input + feature-padding path (state shorter than state_size)
    x_short = jax.random.normal(jax.random.PRNGKey(1), (STATE_SIZE - 4,), jnp.float32)
    p2, v2 = actor_critic_forward(x_short, prepared, STATE_SIZE, ACTION_SIZE)
    jax.block_until_ready((p2, v2))
    x_short_full = jnp.concatenate([x_short, jnp.zeros((4,), jnp.float32)])[None, :]
    rp2, rv2 = _reference_forward(x_short_full, params)
    assert p2.shape == (1, ACTION_SIZE) and v2.shape == (1, 1)
    assert jnp.allclose(p2, rp2, atol=2e-2, rtol=2e-2), "padded-input policy mismatch"
    assert jnp.allclose(v2, rv2, atol=2e-2, rtol=2e-2), "padded-input value mismatch"

    print("KERNEL_OK")
</pallas_src>

<mosaic_0001>
module attributes {stable_mosaic.version = 11 : i64} {
  func.func @_actor_critic_kernel(%arg0: i32, %arg1: memref<256x16xf32, #tpu.memory_space<vmem>>, %arg2: memref<16x256xbf16, #tpu.memory_space<vmem>>, %arg3: memref<1x256xf32, #tpu.memory_space<vmem>>, %arg4: memref<256x256xbf16, #tpu.memory_space<vmem>>, %arg5: memref<1x256xf32, #tpu.memory_space<vmem>>, %arg6: memref<256x128xbf16, #tpu.memory_space<vmem>>, %arg7: memref<1x128xf32, #tpu.memory_space<vmem>>, %arg8: memref<256x128xf32, #tpu.memory_space<vmem>>) attributes {dimension_semantics = [#tpu.dimension_semantics<parallel>], iteration_bounds = array<i64: 1>, scalar_prefetch = 0 : i64, scratch_operands = 0 : i64, tpu.core_type = #tpu.core_type<tc>, window_params = [{transform_indices = @transform_0, window_bounds = array<i64: 256, 16>}, {pipeline_mode = #tpu.pipeline_mode<synchronous>, transform_indices = @transform_1, window_bounds = array<i64: 16, 256>}, {pipeline_mode = #tpu.pipeline_mode<synchronous>, transform_indices = @transform_2, window_bounds = array<i64: 1, 256>}, {pipeline_mode = #tpu.pipeline_mode<synchronous>, transform_indices = @transform_3, window_bounds = array<i64: 256, 256>}, {pipeline_mode = #tpu.pipeline_mode<synchronous>, transform_indices = @transform_4, window_bounds = array<i64: 1, 256>}, {pipeline_mode = #tpu.pipeline_mode<synchronous>, transform_indices = @transform_5, window_bounds = array<i64: 256, 128>}, {pipeline_mode = #tpu.pipeline_mode<synchronous>, transform_indices = @transform_6, window_bounds = array<i64: 1, 128>}, {transform_indices = @transform_7, window_bounds = array<i64: 256, 128>}]} {
    %c0 = arith.constant 0 : index
    %c0_0 = arith.constant 0 : index
    %0 = vector.load %arg1[%c0, %c0_0] : memref<256x16xf32, #tpu.memory_space<vmem>>, vector<256x16xf32>
    %1 = arith.truncf %0 : vector<256x16xf32> to vector<256x16xbf16>
    %c0_1 = arith.constant 0 : index
    %c0_2 = arith.constant 0 : index
    %2 = vector.load %arg2[%c0_1, %c0_2] : memref<16x256xbf16, #tpu.memory_space<vmem>>, vector<16x256xbf16>
    %cst = arith.constant dense<0.000000e+00> : vector<256x256xf32>
    %3 = tpu.matmul %1, %2, %cst {dimension_numbers = #tpu.dot_dimension_numbers<[1], [0], [0], [1], [0, 0, 1, 1], [], []>} : vector<256x16xbf16>, vector<16x256xbf16>, vector<256x256xf32> -> vector<256x256xf32>
    %c0_3 = arith.constant 0 : index
    %c0_4 = arith.constant 0 : index
    %4 = vector.load %arg3[%c0_3, %c0_4] : memref<1x256xf32, #tpu.memory_space<vmem>>, vector<1x256xf32>
    %5 = vector.broadcast %4 : vector<1x256xf32> to vector<256x256xf32>
    %6 = arith.addf %3, %5 : vector<256x256xf32>
    %cst_5 = arith.constant 0.000000e+00 : f32
    %7 = vector.broadcast %cst_5 : f32 to vector<256x256xf32>
    %8 = arith.maximumf %6, %7 : vector<256x256xf32>
    %9 = arith.truncf %8 : vector<256x256xf32> to vector<256x256xbf16>
    %c0_6 = arith.constant 0 : index
    %c0_7 = arith.constant 0 : index
    %10 = vector.load %arg4[%c0_6, %c0_7] : memref<256x256xbf16, #tpu.memory_space<vmem>>, vector<256x256xbf16>
    %cst_8 = arith.constant dense<0.000000e+00> : vector<256x256xf32>
    %11 = tpu.matmul %9, %10, %cst_8 {dimension_numbers = #tpu.dot_dimension_numbers<[1], [0], [0], [1], [0, 0, 1, 1], [], []>} : vector<256x256xbf16>, vector<256x256xbf16>, vector<256x256xf32> -> vector<256x256xf32>
    %c0_9 = arith.constant 0 : index
    %c0_10 = arith.constant 0 : index
    %12 = vector.load %arg5[%c0_9, %c0_10] : memref<1x256xf32, #tpu.memory_space<vmem>>, vector<1x256xf32>
    %13 = vector.broadcast %12 : vector<1x256xf32> to vector<256x256xf32>
    %14 = arith.addf %11, %13 : vector<256x256xf32>
    %cst_11 = arith.constant 0.000000e+00 : f32
    %15 = vector.broadcast %cst_11 : f32 to vector<256x256xf32>
    %16 = arith.maximumf %14, %15 : vector<256x256xf32>
    %17 = arith.truncf %16 : vector<256x256xf32> to vector<256x256xbf16>
    %c0_12 = arith.constant 0 : index
    %c0_13 = arith.constant 0 : index
    %18 = vector.load %arg6[%c0_12, %c0_13] : memref<256x128xbf16, #tpu.memory_space<vmem>>, vector<256x128xbf16>
    %cst_14 = arith.constant dense<0.000000e+00> : vector<256x128xf32>
    %19 = tpu.matmul %17, %18, %cst_14 {dimension_numbers = #tpu.dot_dimension_numbers<[1], [0], [0], [1], [0, 0, 1, 1], [], []>} : vector<256x256xbf16>, vector<256x128xbf16>, vector<256x128xf32> -> vector<256x128xf32>
    %c0_15 = arith.constant 0 : index
    %c0_16 = arith.constant 0 : index
    %20 = vector.load %arg7[%c0_15, %c0_16] : memref<1x128xf32, #tpu.memory_space<vmem>>, vector<1x128xf32>
    %21 = vector.broadcast %20 : vector<1x128xf32> to vector<256x128xf32>
    %22 = arith.addf %19, %21 : vector<256x128xf32>
    %c0_17 = arith.constant 0 : index
    %c0_18 = arith.constant 0 : index
    %23 = vector.load %arg8[%c0_17, %c0_18] : memref<256x128xf32, #tpu.memory_space<vmem>>, vector<256x128xf32>
    tpu.vector_store %arg8[%c0_17, %c0_18], %22 {strides = array<i32>} : memref<256x128xf32, #tpu.memory_space<vmem>>, vector<256x128xf32>,
    return
  }
  func.func @transform_0(%arg0: i32) -> (i32, i32) {
    %c0_i32 = arith.constant 0 : i32
    %c0_i32_0 = arith.constant 0 : i32
    return %arg0, %c0_i32 : i32, i32
  }
  func.func @transform_1(%arg0: i32) -> (i32, i32) {
    %c0_i32 = arith.constant 0 : i32
    %c0_i32_0 = arith.constant 0 : i32
    %c0_i32_1 = arith.constant 0 : i32
    return %c0_i32, %c0_i32_0 : i32, i32
  }
  func.func @transform_2(%arg0: i32) -> (i32, i32) {
    %c0_i32 = arith.constant 0 : i32
    %c0_i32_0 = arith.constant 0 : i32
    %c0_i32_1 = arith.constant 0 : i32
    return %c0_i32, %c0_i32_0 : i32, i32
  }
  func.func @transform_3(%arg0: i32) -> (i32, i32) {
    %c0_i32 = arith.constant 0 : i32
    %c0_i32_0 = arith.constant 0 : i32
    %c0_i32_1 = arith.constant 0 : i32
    return %c0_i32, %c0_i32_0 : i32, i32
  }
  func.func @transform_4(%arg0: i32) -> (i32, i32) {
    %c0_i32 = arith.constant 0 : i32
    %c0_i32_0 = arith.constant 0 : i32
    %c0_i32_1 = arith.constant 0 : i32
    return %c0_i32, %c0_i32_0 : i32, i32
  }
  func.func @transform_5(%arg0: i32) -> (i32, i32) {
    %c0_i32 = arith.constant 0 : i32
    %c0_i32_0 = arith.constant 0 : i32
    %c0_i32_1 = arith.constant 0 : i32
    return %c0_i32, %c0_i32_0 : i32, i32
  }
  func.func @transform_6(%arg0: i32) -> (i32, i32) {
    %c0_i32 = arith.constant 0 : i32
    %c0_i32_0 = arith.constant 0 : i32
    %c0_i32_1 = arith.constant 0 : i32
    return %c0_i32, %c0_i32_0 : i32, i32
  }
  func.func @transform_7(%arg0: i32) -> (i32, i32) {
    %c0_i32 = arith.constant 0 : i32
    %c0_i32_0 = arith.constant 0 : i32
    return %arg0, %c0_i32 : i32, i32
  }
}

</mosaic_0001>

<bundles_post_ra>
// kernel: tpu_custom_call.1
= control target key start
LH: loop header
LB: loop body
LE: loop exit
PB: predicated region body
PF: predicated region fallthrough
CT: control target
= control target key end

     0   :  { %12 = vsyncpa [#allocation3], 0  ;;  %s2121_s0 = inlined_call_operand.vmem [shape: f32[256,16], index: 0, kind: input, shape index: {}]   ;;  %s2122_s1 = inlined_call_operand.vmem [shape: bf16[16,256], index: 1, kind: input, shape index: {}]   ;;  %s2123_s2 = inlined_call_operand.vmem [shape: f32[1,256], index: 2, kind: input, shape index: {}]   ;;  %s2124_s3 = inlined_call_operand.vmem [shape: bf16[256,256], index: 3, kind: input, shape index: {}]   ;;  %s2125_s4 = inlined_call_operand.vmem [shape: f32[1,256], index: 4, kind: input, shape index: {}]   ;;  %s2126_s5 = inlined_call_operand.hbm [shape: bf16[256,128], index: 5, kind: input, shape index: {}]   ;;  %s2127_s6 = inlined_call_operand.vmem [shape: f32[1,128], index: 6, kind: input, shape index: {}]   ;;  %s2128_s7 = inlined_call_operand.hbm [shape: f32[256,128], index: 7, kind: output, shape index: {}]  }
   0x1   :  { %13 = vsyncpa [#allocation4], 0  ;;  %s1593_s24 = smov [#allocation2]   ;;  %s1545_s28 = scalar_lea.hbm %s2126_s5, 2048 }
   0x2   :  { %s29_s25 = sshll.u32 %s1593_s24, 4  ;;  %p1546_p0 = scmp.ne.s32.totalorder %s2126_s5, %s1545_s28  ;;  %s30_s25 = int_to_ptr.vmem [resolvable:$true] %s29_s25 }
   0x3   :  { %p1549_p1 = scmp.lt.u32.totalorder %s1545_s28, %s2126_s5 }
   0x5   :  { %p1551_p2 = pnand %p1549_p1, %p1546_p0 }
   0x7   :  { %1554 = shalt.err (!%p1551_p2)
}
   0x8   :  { %s1555_s10 = scalar_lea.vmem %s30_s25, 2048  ;;  %p1560_p4 = scmp.lt.s32.totalorder %s30_s25, %s30_s25 }
   0x9   :  { %p1556_p3 = scmp.ne.s32.totalorder %s30_s25, %s1555_s10  ;;  %p1561_p5 = scmp.lt.s32.totalorder %s1555_s10, %s1555_s10 }
   0xb   :  { %p1562_p6 = por %p1561_p5, %p1560_p4 }
   0xd   :  { %p1563_p7 = pnand %p1562_p6, %p1556_p3 }
   0xf   :  { %1566 = shalt.err (!%p1563_p7)
}
  0x10   :  { %s1594_s11 = smov 64   ;;  %s1595_s12 = smov 4  }
  0x11   :  { %35 = dma.hbm_to_vmem [thread:$0]  %s2126_s5, 2048, %s30_s25, [#allocation3], %s1594_s11, %s1594_s11, %s1595_s12  }
  0x12   :  { %1589 = dma.done.wait [#allocation3], 2048  }
  0x13   :  { %1590 = vsyncadd [#allocation3], 4294965248  ;;  %v1596_v0 = vmov 0   ;;  %v1478_v1 = vld [vmem:[%s2122_s1 + $0x4] ss:$8 sps:$4 sm:$0xff]   ;;  %vm114_vm0 = vcmask 130048  }
  0x14   :  { %195 = vmatprep.mubr.bf16.mxu0 %v1596_v0  ;;  %275 = vmatprep.mubr.bf16.mxu1 %v1596_v0  ;;  %v1480_v2 = vld [vmem:[%s2122_s1] ss:$8 sps:$4 sm:$0xff]   ;;  %v44_v7 = vld [vmem:[%s2121_s0 + $0x10] sm:$0xff]  ;;  %v45_v8 = vld [vmem:[%s2121_s0 + $0x18] sm:$0xff] }
  0x15   :  { %v42_v3 = vld [vmem:[%s2121_s0] sm:$0xff]  ;;  %v43_v4 = vld [vmem:[%s2121_s0 + $0x8] sm:$0xff]  ;;  %163 = vmatprep.subr.bf16.mxu0 %v1478_v1  ;;  %1469 = vmatprep.subr.bf16.mxu1 %v1478_v1  ;;  %v75_v11 = vpack.c.bf16 %v45_v8, %v44_v7  ;;  %v60_v12 = vld [vmem:[%s2121_s0 + $0x90] sm:$0xff] }
  0x16   :  { %v74_v5 = vpack.c.bf16 %v43_v4, %v42_v3  ;;  %164 = vmatpush1.bf16.msra.mxu0 %v1480_v2  ;;  %1470 = vmatpush1.bf16.msra.mxu1 %v1480_v2  ;;  %v58_v6 = vld [vmem:[%s2121_s0 + $0x80] sm:$0xff]  ;;  %v59_v9 = vld [vmem:[%s2121_s0 + $0x88] sm:$0xff]  ;;  %v61_v13 = vld [vmem:[%s2121_s0 + $0x98] sm:$0xff] }
  0x17   :  { %v82_v10 = vpack.c.bf16 %v59_v9, %v58_v6  ;;  %v1481_v14 = vld [vmem:[%s2124_s3] ss:$8 sps:$4 sm:$0xff]   ;;  %v1483_v15 = vld [vmem:[%s2124_s3 + $0x4] ss:$8 sps:$4 sm:$0xff]   ;;  %v83_v16 = vpack.c.bf16 %v61_v13, %v60_v12  ;;  %v1486_v17 = vld [vmem:[%s2124_s3 + $0x14] ss:$8 sps:$4 sm:$0xff]  }
  0x18   :  { %v46_v18 = vld [vmem:[%s2121_s0 + $0x20] sm:$0xff]  ;;  %v47_v19 = vld [vmem:[%s2121_s0 + $0x28] sm:$0xff]  ;;  %656 = vmatprep.subr.bf16.mxu1 %v1483_v15  ;;  %v1484_v20 = vld [vmem:[%s2124_s3 + $0x10] ss:$8 sps:$4 sm:$0xff]  }
  0x19   :  { %1292 = vmatmul.mubr.msk.bf16.vlgmr.msra.gmra.mrb[0].mxu0 %vm114_vm0, %v74_v5  ;;  %1300 = vmatmul.mubr.msk.bf16.vlgmr.msra.gmra.mrb[0].mxu1 %vm114_vm0, %v82_v10  ;;  %v1489_v21 = vld [vmem:[%s2124_s3 + $0x24] ss:$8 sps:$4 sm:$0xff]   ;;  %v76_v22 = vpack.c.bf16 %v47_v19, %v46_v18  ;;  %v1487_v25 = vld [vmem:[%s2124_s3 + $0x20] ss:$8 sps:$4 sm:$0xff]   ;;  %v1492_v26 = vld [vmem:[%s2124_s3 + $0x34] ss:$8 sps:$4 sm:$0xff]   ;;  %v94_v19 = vlaneseq }
  0x1a   :  { %205 = vmatprep.mubr.bf16.mxu0 %v1596_v0  ;;  %285 = vmatprep.mubr.bf16.mxu1 %v1596_v0  ;;  %v62_v23 = vld [vmem:[%s2121_s0 + $0xa0] sm:$0xff]  ;;  %v63_v24 = vld [vmem:[%s2121_s0 + $0xa8] sm:$0xff]  ;;  %v48_v28 = vld [vmem:[%s2121_s0 + $0x30] sm:$0xff] }
  0x1b   :  { %657 = vmatpush1.bf16.msra.mxu1 %v1481_v14  ;;  %v84_v27 = vpack.c.bf16 %v63_v24, %v62_v23  ;;  %v49_v29 = vld [vmem:[%s2121_s0 + $0x38] sm:$0xff]  ;;  %v1495_v31 = vld [vmem:[%s2124_s3 + $0x44] ss:$8 sps:$4 sm:$0xff]   ;;  %v64_v33 = vld [vmem:[%s2121_s0 + $0xb0] sm:$0xff] }
  0x1c   :  { %658 = vmatprep.subr.bf16.mxu1 %v1486_v17  ;;  %v1490_v30 = vld [vmem:[%s2124_s3 + $0x30] ss:$8 sps:$4 sm:$0xff]   ;;  %v77_v32 = vpack.c.bf16 %v49_v29, %v48_v28  ;;  %v1493_v35 = vld [vmem:[%s2124_s3 + $0x40] ss:$8 sps:$4 sm:$0xff]   ;;  %v1498_v36 = vld [vmem:[%s2124_s3 + $0x54] ss:$8 sps:$4 sm:$0xff]  }
  0x1d   :  { %v65_v34 = vld [vmem:[%s2121_s0 + $0xb8] sm:$0xff]  ;;  %v50_v37 = vld [vmem:[%s2121_s0 + $0x40] sm:$0xff]  ;;  %v51_v38 = vld [vmem:[%s2121_s0 + $0x48] sm:$0xff] }
  0x1e   :  { %v85_v39 = vpack.c.bf16 %v65_v34, %v64_v33  ;;  %v1496_v40 = vld [vmem:[%s2124_s3 + $0x50] ss:$8 sps:$4 sm:$0xff]   ;;  %v1501_v41 = vld [vmem:[%s2124_s3 + $0x64] ss:$8 sps:$4 sm:$0xff]   ;;  %v78_v44 = vpack.c.bf16 %v51_v38, %v50_v37  ;;  %v1499_v45 = vld [vmem:[%s2124_s3 + $0x60] ss:$8 sps:$4 sm:$0xff]  }
  0x1f   :  { %659 = vmatpush1.bf16.msra.mxu1 %v1484_v20  ;;  %v66_v42 = vld [vmem:[%s2121_s0 + $0xc0] sm:$0xff]  ;;  %v67_v43 = vld [vmem:[%s2121_s0 + $0xc8] sm:$0xff]  ;;  %v1504_v46 = vld [vmem:[%s2124_s3 + $0x74] ss:$8 sps:$4 sm:$0xff]   ;;  %v1882_v20 = vshrl.u32 %v94_v19, 7 }
  0x20   :  { %660 = vmatprep.subr.bf16.mxu1 %v1489_v21  ;;  %v52_v47 = vld [vmem:[%s2121_s0 + $0x50] sm:$0xff]  ;;  %v53_v48 = vld [vmem:[%s2121_s0 + $0x58] sm:$0xff]  ;;  %v86_v49 = vpack.c.bf16 %v67_v43, %v66_v42  ;;  %v1507_v51 = vld [vmem:[%s2124_s3 + $0x84] ss:$8 sps:$4 sm:$0xff]  }
  0x21   :  { %1293 = vmatmul.mubr.msk.bf16.gmra.mrb[4].mxu0 %vm114_vm0, %v75_v11  ;;  %1301 = vmatmul.mubr.msk.bf16.gmra.mrb[4].mxu1 %vm114_vm0, %v83_v16  ;;  %v1502_v50 = vld [vmem:[%s2124_s3 + $0x70] ss:$8 sps:$4 sm:$0xff]   ;;  %v79_v52 = vpack.c.bf16 %v53_v48, %v52_v47  ;;  %v1505_v55 = vld [vmem:[%s2124_s3 + $0x80] ss:$8 sps:$4 sm:$0xff]   ;;  %v1510_v56 = vld [vmem:[%s2124_s3 + $0x94] ss:$8 sps:$4 sm:$0xff]  }
  0x22   :  { %215 = vmatprep.mubr.bf16.mxu0 %v1596_v0  ;;  %295 = vmatprep.mubr.bf16.mxu1 %v1596_v0  ;;  %v68_v53 = vld [vmem:[%s2121_s0 + $0xd0] sm:$0xff]  ;;  %v69_v54 = vld [vmem:[%s2121_s0 + $0xd8] sm:$0xff]  ;;  %v54_v58 = vld [vmem:[%s2121_s0 + $0x60] sm:$0xff]  ;;  %v96_v21 = vsub.s32 0, %v1882_v20  ;;  %v100_v23 = vsub.s32 1, %v1882_v20 }
  0x23   :  { %661 = vmatpush1.bf16.msra.mxu1 %v1487_v25  ;;  %v87_v57 = vpack.c.bf16 %v69_v54, %v68_v53  ;;  %v55_v59 = vld [vmem:[%s2121_s0 + $0x68] sm:$0xff]  ;;  %v1508_v60 = vld [vmem:[%s2124_s3 + $0x90] ss:$8 sps:$4 sm:$0xff]   ;;  %v70_v63 = vld [vmem:[%s2121_s0 + $0xe0] sm:$0xff] }
  0x24   :  { %662 = vmatprep.subr.bf16.mxu1 %v1492_v26  ;;  %v1513_v61 = vld [vmem:[%s2124_s3 + $0xa4] ss:$8 sps:$4 sm:$0xff]   ;;  %v80_v62 = vpack.c.bf16 %v55_v59, %v54_v58  ;;  %v1511_v2 = vld [vmem:[%s2124_s3 + $0xa0] ss:$8 sps:$4 sm:$0xff]   ;;  %v1516_v3 = vld [vmem:[%s2124_s3 + $0xb4] ss:$8 sps:$4 sm:$0xff]  }
  0x25   :  { %v71_v1 = vld [vmem:[%s2121_s0 + $0xe8] sm:$0xff]  ;;  %v56_v5 = vld [vmem:[%s2121_s0 + $0x70] sm:$0xff]  ;;  %v57_v6 = vld [vmem:[%s2121_s0 + $0x78] sm:$0xff] }
  0x26   :  { %v88_v4 = vpack.c.bf16 %v71_v1, %v70_v63  ;;  %v1514_v7 = vld [vmem:[%s2124_s3 + $0xb0] ss:$8 sps:$4 sm:$0xff]   ;;  %v1519_v8 = vld [vmem:[%s2124_s3 + $0xc4] ss:$8 sps:$4 sm:$0xff]   ;;  %v81_v9 = vpack.c.bf16 %v57_v6, %v56_v5  ;;  %v1517_v12 = vld [vmem:[%s2124_s3 + $0xc0] ss:$8 sps:$4 sm:$0xff]  }
  0x27   :  { %663 = vmatpush1.bf16.msra.mxu1 %v1490_v30  ;;  %v72_v10 = vld [vmem:[%s2121_s0 + $0xf0] sm:$0xff]  ;;  %v73_v11 = vld [vmem:[%s2121_s0 + $0xf8] sm:$0xff]  ;;  %v1525_v15 = vld [vmem:[%s2124_s3 + $0xe4] ss:$8 sps:$4 sm:$0xff]  }
  0x28   :  { %664 = vmatprep.subr.bf16.mxu1 %v1495_v31  ;;  %v1522_v13 = vld [vmem:[%s2124_s3 + $0xd4] ss:$8 sps:$4 sm:$0xff]   ;;  %v1520_v14 = vld [vmem:[%s2124_s3 + $0xd0] ss:$8 sps:$4 sm:$0xff]   ;;  %v1523_v16 = vld [vmem:[%s2124_s3 + $0xe0] ss:$8 sps:$4 sm:$0xff]  }
  0x29   :  { %1294 = vmatmul.mubr.msk.bf16.gmra.mrb[8].mxu0 %vm114_vm0, %v76_v22  ;;  %1302 = vmatmul.mubr.msk.bf16.gmra.mrb[8].mxu1 %vm114_vm0, %v84_v27  ;;  %v1528_v17 = vld [vmem:[%s2124_s3 + $0xf4] ss:$8 sps:$4 sm:$0xff]   ;;  %v1526_v18 = vld [vmem:[%s2124_s3 + $0xf0] ss:$8 sps:$4 sm:$0xff]   ;;  %v92_v22 = vld [vmem:[%s2123_s2] sm:$0x3] }
  0x2a   :  { %225 = vmatprep.mubr.bf16.mxu0 %v1596_v0  ;;  %305 = vmatprep.mubr.bf16.mxu1 %v1596_v0  ;;  %v1891_v24 = vrot.slane %v92_v22, %v96_v21  ;;  %v1895_v25 = vrot.slane %v92_v22, %v100_v23  ;;  %v1529_v33 = vld [vmem:[#allocation2 + $0x40] sm:$0xff]  }
  0x2b   :  { %665 = vmatpush1.bf16.msra.mxu1 %v1493_v35  ;;  %v1530_v34 = vld [vmem:[#allocation2] sm:$0xff]   ;;  %v1531_v35 = vld [vmem:[#allocation2 + $0x48] sm:$0xff]   ;;  %1357 = vmatprep.subr.bf16.mxu0 %v1529_v33 }
  0x2c   :  { %666 = vmatprep.subr.bf16.mxu1 %v1498_v36  ;;  %1358 = vmatpush3.bf16.msra.mxu0 %v1530_v34  ;;  %v1537_v19 = vld [vmem:[#allocation2 + $0x60] sm:$0xff]  }
  0x2d   :  { %1359 = vmatprep.subr.bf16.mxu0 %v1531_v35  ;;  %v1538_v35 = vld [vmem:[#allocation2 + $0x20] sm:$0xff]  }
  0x2f   :  { %667 = vmatpush1.bf16.msra.mxu1 %v1496_v40 }
  0x30   :  { %668 = vmatprep.subr.bf16.mxu1 %v1501_v41 }
  0x31   :  { %1295 = vmatmul.mubr.msk.bf16.gmra.mrb[12].mxu0 %vm114_vm0, %v77_v32  ;;  %1303 = vmatmul.mubr.msk.bf16.gmra.mrb[12].mxu1 %vm114_vm0, %v85_v39 }
  0x32   :  { %235 = vmatprep.mubr.bf16.mxu0 %v1596_v0  ;;  %315 = vmatprep.mubr.bf16.mxu1 %v1596_v0 }
  0x33   :  { %669 = vmatpush1.bf16.msra.mxu1 %v1499_v45 }
  0x34   :  { %670 = vmatprep.subr.bf16.mxu1 %v1504_v46  ;;  %v1532_v46 = vld [vmem:[#allocation2 + $0x8] sm:$0xff]  }
  0x35   :  { %1360 = vmatpush3.bf16.msra.mxu0 %v1532_v46 }
  0x37   :  { %671 = vmatpush1.bf16.msra.mxu1 %v1502_v50 }
  0x38   :  { %672 = vmatprep.subr.bf16.mxu1 %v1507_v51  ;;  %v1533_v51 = vld [vmem:[#allocation2 + $0x50] sm:$0xff]  }
  0x39   :  { %1296 = vmatmul.mubr.msk.bf16.gmra.mrb[16].mxu0 %vm114_vm0, %v78_v44  ;;  %1304 = vmatmul.mubr.msk.bf16.gmra.mrb[16].mxu1 %vm114_vm0, %v86_v49 }
  0x3a   :  { %245 = vmatprep.mubr.bf16.mxu0 %v1596_v0  ;;  %325 = vmatprep.mubr.bf16.mxu1 %v1596_v0 }
  0x3b   :  { %673 = vmatpush1.bf16.msra.mxu1 %v1505_v55  ;;  %1361 = vmatprep.subr.bf16.mxu0 %v1533_v51  ;;  %v1540_v51 = vld [vmem:[#allocation2 + $0x28] sm:$0xff]  }
  0x3c   :  { %674 = vmatprep.subr.bf16.mxu1 %v1510_v56 }
  0x3f   :  { %675 = vmatpush1.bf16.msra.mxu1 %v1508_v60 }
  0x40   :  { %676 = vmatprep.subr.bf16.mxu1 %v1513_v61 }
  0x41   :  { %1297 = vmatmul.mubr.msk.bf16.gmra.mrb[20].mxu0 %vm114_vm0, %v79_v52  ;;  %1305 = vmatmul.mubr.msk.bf16.gmra.mrb[20].mxu1 %vm114_vm0, %v87_v57 }
  0x42   :  { %255 = vmatprep.mubr.bf16.mxu0 %v1596_v0  ;;  %335 = vmatprep.mubr.bf16.mxu1 %v1596_v0 }
  0x43   :  { %677 = vmatpush1.bf16.msra.mxu1 %v1511_v2 }
  0x44   :  { %678 = vmatprep.subr.bf16.mxu1 %v1516_v3  ;;  %v1535_v3 = vld [vmem:[#allocation2 + $0x58] sm:$0xff]  }
  0x47   :  { %679 = vmatpush1.bf16.msra.mxu1 %v1514_v7 }
  0x48   :  { %680 = vmatprep.subr.bf16.mxu1 %v1519_v8 }
  0x49   :  { %1298 = vmatmul.mubr.msk.bf16.gmra.mrb[24].mxu0 %vm114_vm0, %v80_v62  ;;  %1306 = vmatmul.mubr.msk.bf16.gmra.mrb[24].mxu1 %vm114_vm0, %v88_v4  ;;  %v1534_v62 = vld [vmem:[#allocation2 + $0x10] sm:$0xff]  }
  0x4a   :  { %265 = vmatprep.mubr.bf16.mxu0 %v1596_v0  ;;  %345 = vmatprep.mubr.bf16.mxu1 %v1596_v0  ;;  %v89_v0 = vpack.c.bf16 %v73_v11, %v72_v10 }
  0x4b   :  { %681 = vmatpush1.bf16.msra.mxu1 %v1517_v12  ;;  %1362 = vmatpush3.bf16.msra.mxu0 %v1534_v62 }
  0x4c   :  { %682 = vmatprep.subr.bf16.mxu1 %v1522_v13  ;;  %1363 = vmatprep.subr.bf16.mxu0 %v1535_v3 }
  0x4f   :  { %683 = vmatpush1.bf16.msra.mxu1 %v1520_v14  ;;  %v1536_v14 = vld [vmem:[#allocation2 + $0x18] sm:$0xff]  }
  0x50   :  { %684 = vmatprep.subr.bf16.mxu1 %v1525_v15  ;;  %1364 = vmatpush3.bf16.msra.mxu0 %v1536_v14 }
  0x51   :  { %1299 = vmatmul.mubr.msk.bf16.gmra.mrb[28].mxu0 %vm114_vm0, %v81_v9  ;;  %1307 = vmatmul.mubr.msk.bf16.gmra.mrb[28].mxu1 %vm114_vm0, %v89_v0 }
  0x52   :  { %1365 = vmatprep.subr.bf16.mxu0 %v1537_v19 }
  0x53   :  { %685 = vmatpush1.bf16.msra.mxu1 %v1523_v16 }
  0x54   :  { %686 = vmatprep.subr.bf16.mxu1 %v1528_v17  ;;  %1366 = vmatpush3.bf16.msra.mxu0 %v1538_v35 }
  0x57   :  { %687 = vmatpush1.bf16.msra.mxu1 %v1526_v18 }
  0xec   :  { %v197_v26 = vpop.f32.mrb[0].mxu0  ;;  %v277_v37 = vpop.f32.mrb[0].mxu1 }
  0xed   :  { %v198_v27 = vadd.f32 %v197_v26, %v1891_v24  ;;  %v199_v28 = vpop.f32.mrb[1].mxu0  ;;  %v278_v40 = vadd.f32 %v277_v37, %v1891_v24  ;;  %v279_v41 = vpop.f32.mrb[1].mxu1 }
  0xee   :  { %v200_v29 = vadd.f32 %v199_v28, %v1895_v25  ;;  %v201_v30 = vpop.f32.mrb[2].mxu0  ;;  %v280_v44 = vadd.f32 %v279_v41, %v1895_v25  ;;  %v281_v45 = vpop.f32.mrb[2].mxu1 }
  0xef   :  { %v202_v31 = vadd.f32 %v201_v30, %v1891_v24  ;;  %v203_v32 = vpop.f32.mrb[3].mxu0  ;;  %v356_v38 = vmax.f32 %v198_v27, 0.0  ;;  %v388_v48 = vmax.f32 %v278_v40, 0.0  ;;  %v282_v49 = vadd.f32 %v281_v45, %v1891_v24  ;;  %v283_v50 = vpop.f32.mrb[3].mxu1 }
  0xf0   :  { %v204_v36 = vadd.f32 %v203_v32, %v1895_v25  ;;  %v357_v42 = vmax.f32 %v200_v29, 0.0  ;;  %v389_v54 = vmax.f32 %v280_v44, 0.0  ;;  %v284_v55 = vadd.f32 %v283_v50, %v1895_v25 }
  0xf1   :  { %v358_v39 = vmax.f32 %v202_v31, 0.0  ;;  %v390_v58 = vmax.f32 %v282_v49, 0.0 }
  0xf2   :  { %v359_v43 = vmax.f32 %v204_v36, 0.0  ;;  %v391_v61 = vmax.f32 %v284_v55, 0.0 }
  0xf3   :  { %v420_v47 = vpack.c.bf16 %v358_v39, %v356_v38  ;;  %v1908_v2 = vpack.c.bf16 %v390_v58, %v388_v48  ;;  %v1539_v39 = vld [vmem:[#allocation2 + $0x68] sm:$0xff]  }
  0xf4   :  { %v421_v52 = vpack.c.bf16 %v359_v43, %v357_v42  ;;  %v207_v53 = vpop.f32.mrb[4].mxu0  ;;  %v1911_v5 = vpack.c.bf16 %v391_v61, %v389_v54  ;;  %v287_v6 = vpop.f32.mrb[4].mxu1  ;;  %1367 = vmatprep.subr.bf16.mxu0 %v1539_v39 }
  0xf5   :  { %v208_v56 = vadd.f32 %v207_v53, %v1891_v24  ;;  %v209_v57 = vpop.f32.mrb[5].mxu0  ;;  %v288_v9 = vadd.f32 %v287_v6, %v1891_v24  ;;  %v289_v10 = vpop.f32.mrb[5].mxu1  ;;  %1368 = vmatpush3.bf16.msra.mxu0 %v1540_v51  ;;  %v1542_v6 = vld [vmem:[#allocation2 + $0x30] sm:$0xff]  }
  0xf6   :  { %v210_v59 = vadd.f32 %v209_v57, %v1895_v25  ;;  %v211_v60 = vpop.f32.mrb[6].mxu0  ;;  %688 = vmatprep.mubr.bf16.mxu1 %v421_v52  ;;  %v290_v13 = vadd.f32 %v289_v10, %v1895_v25  ;;  %v291_v0 = vpop.f32.mrb[6].mxu1 }
  0xf7   :  { %v212_v63 = vadd.f32 %v211_v60, %v1891_v24  ;;  %v213_v1 = vpop.f32.mrb[7].mxu0  ;;  %689 = vmatmul.mubr.bf16.vlgmr.msra.gmra.mrb[32].mxu1 %v420_v47  ;;  %v360_v7 = vmax.f32 %v208_v56, 0.0  ;;  %v392_v16 = vmax.f32 %v288_v9, 0.0  ;;  %v292_v17 = vadd.f32 %v291_v0, %v1891_v24  ;;  %v293_v18 = vpop.f32.mrb[7].mxu1  ;;  %v1541_v56 = vld [vmem:[#allocation2 + $0x70] sm:$0xff]  }
  0xf8   :  { %v214_v4 = vadd.f32 %v213_v1, %v1895_v25  ;;  %v361_v11 = vmax.f32 %v210_v59, 0.0  ;;  %v393_v27 = vmax.f32 %v290_v13, 0.0  ;;  %v294_v28 = vadd.f32 %v293_v18, %v1895_v25  ;;  %1369 = vmatprep.subr.bf16.mxu0 %v1541_v56 }
  0xf9   :  { %v362_v8 = vmax.f32 %v212_v63, 0.0  ;;  %v394_v31 = vmax.f32 %v292_v17, 0.0  ;;  %1370 = vmatpush3.bf16.msra.mxu0 %v1542_v6 }
  0xfa   :  { %v363_v12 = vmax.f32 %v214_v4, 0.0  ;;  %v395_v34 = vmax.f32 %v294_v28, 0.0 }
  0xfb   :  { %v422_v15 = vpack.c.bf16 %v362_v8, %v360_v7  ;;  %v1920_v38 = vpack.c.bf16 %v394_v31, %v392_v16 }
  0xfc   :  { %v423_v22 = vpack.c.bf16 %v363_v12, %v361_v11  ;;  %v217_v26 = vpop.f32.mrb[8].mxu0  ;;  %v1923_v41 = vpack.c.bf16 %v395_v34, %v393_v27  ;;  %v297_v42 = vpop.f32.mrb[8].mxu1 }
  0xfd   :  { %v218_v29 = vadd.f32 %v217_v26, %v1891_v24  ;;  %v219_v30 = vpop.f32.mrb[9].mxu0  ;;  %v298_v45 = vadd.f32 %v297_v42, %v1891_v24  ;;  %v299_v46 = vpop.f32.mrb[9].mxu1 }
  0xfe   :  { %v220_v32 = vadd.f32 %v219_v30, %v1895_v25  ;;  %v221_v33 = vpop.f32.mrb[10].mxu0  ;;  %698 = vmatprep.mubr.bf16.mxu1 %v423_v22  ;;  %v300_v49 = vadd.f32 %v299_v46, %v1895_v25  ;;  %v301_v50 = vpop.f32.mrb[10].mxu1 }
  0xff   :  { %v222_v36 = vadd.f32 %v221_v33, %v1891_v24  ;;  %v223_v37 = vpop.f32.mrb[11].mxu0  ;;  %699 = vmatmul.mubr.bf16.gmra.mrb[36].mxu1 %v422_v15  ;;  %v364_v43 = vmax.f32 %v218_v29, 0.0  ;;  %v396_v53 = vmax.f32 %v298_v45, 0.0  ;;  %v302_v54 = vadd.f32 %v301_v50, %v1891_v24  ;;  %v303_v55 = vpop.f32.mrb[11].mxu1 }
 0x100   :  { %v224_v40 = vadd.f32 %v223_v37, %v1895_v25  ;;  %v365_v47 = vmax.f32 %v220_v32, 0.0  ;;  %v397_v59 = vmax.f32 %v300_v49, 0.0  ;;  %v304_v60 = vadd.f32 %v303_v55, %v1895_v25 }
 0x101   :  { %v366_v44 = vmax.f32 %v222_v36, 0.0  ;;  %v398_v63 = vmax.f32 %v302_v54, 0.0 }
 0x102   :  { %v367_v48 = vmax.f32 %v224_v40, 0.0  ;;  %v399_v4 = vmax.f32 %v304_v60, 0.0 }
 0x103   :  { %v424_v52 = vpack.c.bf16 %v366_v44, %v364_v43  ;;  %v1932_v9 = vpack.c.bf16 %v398_v63, %v396_v53 }
 0x104   :  { %v425_v57 = vpack.c.bf16 %v367_v48, %v365_v47  ;;  %v227_v58 = vpop.f32.mrb[12].mxu0  ;;  %v1935_v11 = vpack.c.bf16 %v399_v4, %v397_v59  ;;  %v307_v12 = vpop.f32.mrb[12].mxu1 }
 0x105   :  { %v228_v61 = vadd.f32 %v227_v58, %v1891_v24  ;;  %v229_v62 = vpop.f32.mrb[13].mxu0  ;;  %v308_v14 = vadd.f32 %v307_v12, %v1891_v24  ;;  %v309_v15 = vpop.f32.mrb[13].mxu1 }
 0x106   :  { %v230_v1 = vadd.f32 %v229_v62, %v1895_v25  ;;  %v231_v3 = vpop.f32.mrb[14].mxu0  ;;  %708 = vmatprep.mubr.bf16.mxu1 %v425_v57  ;;  %v310_v18 = vadd.f32 %v309_v15, %v1895_v25  ;;  %v311_v19 = vpop.f32.mrb[14].mxu1 }
 0x107   :  { %v232_v7 = vadd.f32 %v231_v3, %v1891_v24  ;;  %v233_v8 = vpop.f32.mrb[15].mxu0  ;;  %709 = vmatmul.mubr.bf16.gmra.mrb[40].mxu1 %v424_v52  ;;  %v368_v13 = vmax.f32 %v228_v61, 0.0  ;;  %v400_v26 = vmax.f32 %v308_v14, 0.0  ;;  %v312_v27 = vadd.f32 %v311_v19, %v1891_v24  ;;  %v313_v28 = vpop.f32.mrb[15].mxu1 }
 0x108   :  { %v234_v10 = vadd.f32 %v233_v8, %v1895_v25  ;;  %v369_v16 = vmax.f32 %v230_v1, 0.0  ;;  %v401_v31 = vmax.f32 %v310_v18, 0.0  ;;  %v314_v32 = vadd.f32 %v313_v28, %v1895_v25 }
 0x109   :  { %v370_v0 = vmax.f32 %v232_v7, 0.0  ;;  %v402_v35 = vmax.f32 %v312_v27, 0.0 }
 0x10a   :  { %v371_v17 = vmax.f32 %v234_v10, 0.0  ;;  %v403_v39 = vmax.f32 %v314_v32, 0.0 }
 0x10b   :  { %v426_v22 = vpack.c.bf16 %v370_v0, %v368_v13  ;;  %v1944_v43 = vpack.c.bf16 %v402_v35, %v400_v26 }
 0x10c   :  { %v427_v29 = vpack.c.bf16 %v371_v17, %v369_v16  ;;  %v237_v30 = vpop.f32.mrb[16].mxu0  ;;  %v1947_v45 = vpack.c.bf16 %v403_v39, %v401_v31  ;;  %v317_v46 = vpop.f32.mrb[16].mxu1 }
 0x10d   :  { %v238_v33 = vadd.f32 %v237_v30, %v1891_v24  ;;  %v239_v34 = vpop.f32.mrb[17].mxu0  ;;  %v318_v49 = vadd.f32 %v317_v46, %v1891_v24  ;;  %v319_v50 = vpop.f32.mrb[17].mxu1 }
 0x10e   :  { %v240_v36 = vadd.f32 %v239_v34, %v1895_v25  ;;  %v241_v37 = vpop.f32.mrb[18].mxu0  ;;  %718 = vmatprep.mubr.bf16.mxu1 %v427_v29  ;;  %v320_v53 = vadd.f32 %v319_v50, %v1895_v25  ;;  %v321_v54 = vpop.f32.mrb[18].mxu1 }
 0x10f   :  { %v242_v40 = vadd.f32 %v241_v37, %v1891_v24  ;;  %v243_v42 = vpop.f32.mrb[19].mxu0  ;;  %719 = vmatmul.mubr.bf16.gmra.mrb[44].mxu1 %v426_v22  ;;  %v372_v47 = vmax.f32 %v238_v33, 0.0  ;;  %v404_v56 = vmax.f32 %v318_v49, 0.0  ;;  %v322_v57 = vadd.f32 %v321_v54, %v1891_v24  ;;  %v323_v58 = vpop.f32.mrb[19].mxu1 }
 0x110   :  { %v244_v44 = vadd.f32 %v243_v42, %v1895_v25  ;;  %v373_v51 = vmax.f32 %v240_v36, 0.0  ;;  %v405_v61 = vmax.f32 %v320_v53, 0.0  ;;  %v324_v62 = vadd.f32 %v323_v58, %v1895_v25 }
 0x111   :  { %v374_v48 = vmax.f32 %v242_v40, 0.0  ;;  %v406_v3 = vmax.f32 %v322_v57, 0.0 }
 0x112   :  { %v375_v52 = vmax.f32 %v244_v44, 0.0  ;;  %v407_v7 = vmax.f32 %v324_v62, 0.0 }
 0x113   :  { %v428_v55 = vpack.c.bf16 %v374_v48, %v372_v47  ;;  %v1956_v12 = vpack.c.bf16 %v406_v3, %v404_v56 }
 0x114   :  { %v429_v59 = vpack.c.bf16 %v375_v52, %v373_v51  ;;  %v247_v60 = vpop.f32.mrb[20].mxu0  ;;  %v1959_v0 = vpack.c.bf16 %v407_v7, %v405_v61  ;;  %v327_v14 = vpop.f32.mrb[20].mxu1 }
 0x115   :  { %v248_v63 = vadd.f32 %v247_v60, %v1891_v24  ;;  %v249_v1 = vpop.f32.mrb[21].mxu0  ;;  %v328_v17 = vadd.f32 %v327_v14, %v1891_v24  ;;  %v329_v18 = vpop.f32.mrb[21].mxu1 }
 0x116   :  { %v250_v4 = vadd.f32 %v249_v1, %v1895_v25  ;;  %v251_v6 = vpop.f32.mrb[22].mxu0  ;;  %728 = vmatprep.mubr.bf16.mxu1 %v429_v59  ;;  %v330_v26 = vadd.f32 %v329_v18, %v1895_v25  ;;  %v331_v27 = vpop.f32.mrb[22].mxu1 }
 0x117   :  { %v252_v8 = vadd.f32 %v251_v6, %v1891_v24  ;;  %v253_v10 = vpop.f32.mrb[23].mxu0  ;;  %729 = vmatmul.mubr.bf16.gmra.mrb[48].mxu1 %v428_v55  ;;  %v376_v15 = vmax.f32 %v248_v63, 0.0  ;;  %v408_v29 = vmax.f32 %v328_v17, 0.0  ;;  %v332_v30 = vadd.f32 %v331_v27, %v1891_v24  ;;  %v333_v31 = vpop.f32.mrb[23].mxu1 }
 0x118   :  { %v254_v13 = vadd.f32 %v253_v10, %v1895_v25  ;;  %v377_v19 = vmax.f32 %v250_v4, 0.0  ;;  %v409_v34 = vmax.f32 %v330_v26, 0.0  ;;  %v334_v35 = vadd.f32 %v333_v31, %v1895_v25 }
 0x119   :  { %v378_v16 = vmax.f32 %v252_v8, 0.0  ;;  %v410_v39 = vmax.f32 %v332_v30, 0.0 }
 0x11a   :  { %v379_v22 = vmax.f32 %v254_v13, 0.0  ;;  %v411_v44 = vmax.f32 %v334_v35, 0.0 }
 0x11b   :  { %v430_v28 = vpack.c.bf16 %v378_v16, %v376_v15  ;;  %v1968_v48 = vpack.c.bf16 %v410_v39, %v408_v29 }
 0x11c   :  { %v431_v32 = vpack.c.bf16 %v379_v22, %v377_v19  ;;  %v257_v33 = vpop.f32.mrb[24].mxu0  ;;  %v1971_v50 = vpack.c.bf16 %v411_v44, %v409_v34  ;;  %v337_v51 = vpop.f32.mrb[24].mxu1 }
 0x11d   :  { %v258_v36 = vadd.f32 %v257_v33, %v1891_v24  ;;  %v259_v37 = vpop.f32.mrb[25].mxu0  ;;  %v338_v54 = vadd.f32 %v337_v51, %v1891_v24  ;;  %v339_v55 = vpop.f32.mrb[25].mxu1 }
 0x11e   :  { %v260_v40 = vadd.f32 %v259_v37, %v1895_v25  ;;  %v261_v42 = vpop.f32.mrb[26].mxu0  ;;  %738 = vmatprep.mubr.bf16.mxu1 %v431_v32  ;;  %v340_v58 = vadd.f32 %v339_v55, %v1895_v25  ;;  %v341_v59 = vpop.f32.mrb[26].mxu1 }
 0x11f   :  { %v262_v46 = vadd.f32 %v261_v42, %v1891_v24  ;;  %v263_v47 = vpop.f32.mrb[27].mxu0  ;;  %739 = vmatmul.mubr.bf16.gmra.mrb[52].mxu1 %v430_v28  ;;  %v380_v52 = vmax.f32 %v258_v36, 0.0  ;;  %v412_v61 = vmax.f32 %v338_v54, 0.0  ;;  %v342_v62 = vadd.f32 %v341_v59, %v1891_v24  ;;  %v343_v63 = vpop.f32.mrb[27].mxu1 }
 0x120   :  { %v264_v49 = vadd.f32 %v263_v47, %v1895_v25  ;;  %v381_v56 = vmax.f32 %v260_v40, 0.0  ;;  %v413_v4 = vmax.f32 %v340_v58, 0.0  ;;  %v344_v6 = vadd.f32 %v343_v63, %v1895_v25 }
 0x121   :  { %v382_v53 = vmax.f32 %v262_v46, 0.0  ;;  %v414_v10 = vmax.f32 %v342_v62, 0.0 }
 0x122   :  { %v383_v57 = vmax.f32 %v264_v49, 0.0  ;;  %v415_v15 = vmax.f32 %v344_v6, 0.0 }
 0x123   :  { %v432_v60 = vpack.c.bf16 %v382_v53, %v380_v52  ;;  %v448_v18 = vpack.c.bf16 %v414_v10, %v412_v61 }
 0x124   :  { %v433_v1 = vpack.c.bf16 %v383_v57, %v381_v56  ;;  %v267_v3 = vpop.f32.mrb[28].mxu0  ;;  %v449_v22 = vpack.c.bf16 %v415_v15, %v413_v4  ;;  %v347_v26 = vpop.f32.mrb[28].mxu1 }
 0x125   :  { %v268_v7 = vadd.f32 %v267_v3, %v1891_v24  ;;  %v269_v8 = vpop.f32.mrb[29].mxu0  ;;  %v348_v29 = vadd.f32 %v347_v26, %v1891_v24  ;;  %v349_v30 = vpop.f32.mrb[29].mxu1 }
 0x126   :  { %v270_v13 = vadd.f32 %v269_v8, %v1895_v25  ;;  %v271_v14 = vpop.f32.mrb[30].mxu0  ;;  %748 = vmatprep.mubr.bf16.mxu1 %v433_v1  ;;  %v350_v33 = vadd.f32 %v349_v30, %v1895_v25  ;;  %v351_v34 = vpop.f32.mrb[30].mxu1 }
 0x127   :  { %v272_v16 = vadd.f32 %v271_v14, %v1891_v24  ;;  %v273_v17 = vpop.f32.mrb[31].mxu0  ;;  %749 = vmatmul.mubr.bf16.gmra.mrb[56].mxu1 %v432_v60  ;;  %v384_v27 = vmax.f32 %v268_v7, 0.0  ;;  %v416_v36 = vmax.f32 %v348_v29, 0.0  ;;  %v352_v37 = vadd.f32 %v351_v34, %v1891_v24  ;;  %v353_v39 = vpop.f32.mrb[31].mxu1  ;;  %v1543_v24 = vld [vmem:[#allocation2 + $0x78] sm:$0xff]  }
 0x128   :  { %v274_v19 = vadd.f32 %v273_v17, %v1895_v25  ;;  %v385_v31 = vmax.f32 %v270_v13, 0.0  ;;  %v417_v42 = vmax.f32 %v350_v33, 0.0  ;;  %v354_v44 = vadd.f32 %v353_v39, %v1895_v25  ;;  %v1544_v25 = vld [vmem:[#allocation2 + $0x38] sm:$0xff]   ;;  %1371 = vmatprep.subr.bf16.mxu0 %v1543_v24 }
 0x129   :  { %v386_v28 = vmax.f32 %v272_v16, 0.0  ;;  %v418_v46 = vmax.f32 %v352_v37, 0.0  ;;  %1372 = vmatpush3.bf16.msra.mxu0 %v1544_v25 }
 0x12a   :  { %v387_v32 = vmax.f32 %v274_v19, 0.0  ;;  %v419_v47 = vmax.f32 %v354_v44, 0.0 }
 0x12b   :  { %v434_v35 = vpack.c.bf16 %v386_v28, %v384_v27  ;;  %v450_v49 = vpack.c.bf16 %v418_v46, %v416_v36 }
 0x12c   :  { %v435_v40 = vpack.c.bf16 %v387_v32, %v385_v31  ;;  %v451_v51 = vpack.c.bf16 %v419_v47, %v417_v42 }
 0x12e   :  { %758 = vmatprep.mubr.bf16.mxu1 %v435_v40 }
 0x12f   :  { %759 = vmatmul.mubr.bf16.gmra.mrb[60].mxu1 %v434_v35 }
 0x130   :  { %768 = vmatprep.mubr.bf16.mxu1 %v1911_v5 }
 0x137   :  { %769 = vmatmul.mubr.bf16.gmra.mrb[64].mxu1 %v1908_v2  ;;  %v484_v2 = vld [vmem:[%s2125_s4] sm:$0x3] }
 0x138   :  { %778 = vmatprep.mubr.bf16.mxu1 %v1923_v41  ;;  %v2002_v5 = vrot.slane %v484_v2, %v96_v21 }
 0x13f   :  { %779 = vmatmul.mubr.bf16.gmra.mrb[68].mxu1 %v1920_v38  ;;  %v2006_v38 = vrot.slane %v484_v2, %v100_v23 }
 0x140   :  { %788 = vmatprep.mubr.bf16.mxu1 %v1935_v11 }
 0x147   :  { %789 = vmatmul.mubr.bf16.gmra.mrb[72].mxu1 %v1932_v9 }
 0x148   :  { %798 = vmatprep.mubr.bf16.mxu1 %v1947_v45 }
 0x14f   :  { %799 = vmatmul.mubr.bf16.gmra.mrb[76].mxu1 %v1944_v43 }
 0x150   :  { %808 = vmatprep.mubr.bf16.mxu1 %v1959_v0 }
 0x157   :  { %809 = vmatmul.mubr.bf16.gmra.mrb[80].mxu1 %v1956_v12 }
 0x158   :  { %818 = vmatprep.mubr.bf16.mxu1 %v1971_v50 }
 0x15f   :  { %819 = vmatmul.mubr.bf16.gmra.mrb[84].mxu1 %v1968_v48 }
 0x160   :  { %828 = vmatprep.mubr.bf16.mxu1 %v449_v22 }
 0x167   :  { %829 = vmatmul.mubr.bf16.gmra.mrb[88].mxu1 %v448_v18 }
 0x168   :  { %838 = vmatprep.mubr.bf16.mxu1 %v451_v51 }
 0x16f   :  { %839 = vmatmul.mubr.bf16.gmra.mrb[92].mxu1 %v450_v49 }
 0x1ca   :  { %v690_v41 = vpop.f32.mrb[32].mxu1 }
 0x1cb   :  { %v691_v9 = vadd.f32 %v690_v41, %v2002_v5  ;;  %v692_v11 = vpop.f32.mrb[33].mxu1 }
 0x1cc   :  { %v693_v43 = vadd.f32 %v692_v11, %v2006_v38  ;;  %v694_v45 = vpop.f32.mrb[34].mxu1 }
 0x1cd   :  { %v695_v12 = vadd.f32 %v694_v45, %v2002_v5  ;;  %v696_v0 = vpop.f32.mrb[35].mxu1  ;;  %v849_v50 = vmax.f32 %v691_v9, 0.0 }
 0x1ce   :  { %v697_v48 = vadd.f32 %v696_v0, %v2006_v38  ;;  %v850_v21 = vmax.f32 %v693_v43, 0.0 }
 0x1cf   :  { %v851_v52 = vmax.f32 %v695_v12, 0.0 }
 0x1d0   :  { %v852_v53 = vmax.f32 %v697_v48, 0.0 }
 0x1d1   :  { %v913_v54 = vpack.c.bf16 %v851_v52, %v849_v50 }
 0x1d2   :  { %v914_v20 = vpack.c.bf16 %v852_v53, %v850_v21  ;;  %v700_v23 = vpop.f32.mrb[36].mxu1 }
 0x1d3   :  { %v701_v55 = vadd.f32 %v700_v23, %v2002_v5  ;;  %v702_v56 = vpop.f32.mrb[37].mxu1 }
 0x1d4   :  { %v703_v57 = vadd.f32 %v702_v56, %v2006_v38  ;;  %v704_v58 = vpop.f32.mrb[38].mxu1  ;;  %1112 = vmatprep.mubr.bf16.mxu0 %v914_v20 }
 0x1d5   :  { %v705_v59 = vadd.f32 %v704_v58, %v2002_v5  ;;  %v706_v60 = vpop.f32.mrb[39].mxu1  ;;  %1113 = vmatmul.mubr.bf16.vlgmr.msra.gmra.mrb[32].mxu0 %v913_v54  ;;  %v853_v62 = vmax.f32 %v701_v55, 0.0 }
 0x1d6   :  { %v707_v61 = vadd.f32 %v706_v60, %v2006_v38  ;;  %v854_v1 = vmax.f32 %v703_v57, 0.0 }
 0x1d7   :  { %v855_v63 = vmax.f32 %v705_v59, 0.0 }
 0x1d8   :  { %v856_v3 = vmax.f32 %v707_v61, 0.0 }
 0x1d9   :  { %v915_v4 = vpack.c.bf16 %v855_v63, %v853_v62 }
 0x1da   :  { %v916_v6 = vpack.c.bf16 %v856_v3, %v854_v1  ;;  %v710_v7 = vpop.f32.mrb[40].mxu1 }
 0x1db   :  { %v711_v8 = vadd.f32 %v710_v7, %v2002_v5  ;;  %v712_v10 = vpop.f32.mrb[41].mxu1 }
 0x1dc   :  { %v713_v13 = vadd.f32 %v712_v10, %v2006_v38  ;;  %v714_v14 = vpop.f32.mrb[42].mxu1  ;;  %1120 = vmatprep.mubr.bf16.mxu0 %v916_v6 }
 0x1dd   :  { %v715_v15 = vadd.f32 %v714_v14, %v2002_v5  ;;  %v716_v16 = vpop.f32.mrb[43].mxu1  ;;  %1121 = vmatmul.mubr.bf16.gmra.mrb[36].mxu0 %v915_v4  ;;  %v857_v18 = vmax.f32 %v711_v8, 0.0 }
 0x1de   :  { %v717_v17 = vadd.f32 %v716_v16, %v2006_v38  ;;  %v858_v22 = vmax.f32 %v713_v13, 0.0 }
 0x1df   :  { %v859_v19 = vmax.f32 %v715_v15, 0.0 }
 0x1e0   :  { %v860_v26 = vmax.f32 %v717_v17, 0.0 }
 0x1e1   :  { %v917_v27 = vpack.c.bf16 %v859_v19, %v857_v18 }
 0x1e2   :  { %v918_v28 = vpack.c.bf16 %v860_v26, %v858_v22  ;;  %v720_v29 = vpop.f32.mrb[44].mxu1 }
 0x1e3   :  { %v721_v30 = vadd.f32 %v720_v29, %v2002_v5  ;;  %v722_v31 = vpop.f32.mrb[45].mxu1 }
 0x1e4   :  { %v723_v32 = vadd.f32 %v722_v31, %v2006_v38  ;;  %v724_v33 = vpop.f32.mrb[46].mxu1  ;;  %1128 = vmatprep.mubr.bf16.mxu0 %v918_v28 }
 0x1e5   :  { %v725_v34 = vadd.f32 %v724_v33, %v2002_v5  ;;  %v726_v35 = vpop.f32.mrb[47].mxu1  ;;  %1129 = vmatmul.mubr.bf16.gmra.mrb[40].mxu0 %v917_v27  ;;  %v861_v37 = vmax.f32 %v721_v30, 0.0 }
 0x1e6   :  { %v727_v36 = vadd.f32 %v726_v35, %v2006_v38  ;;  %v862_v40 = vmax.f32 %v723_v32, 0.0 }
 0x1e7   :  { %v863_v39 = vmax.f32 %v725_v34, 0.0 }
 0x1e8   :  { %v864_v42 = vmax.f32 %v727_v36, 0.0 }
 0x1e9   :  { %v919_v44 = vpack.c.bf16 %v863_v39, %v861_v37 }
 0x1ea   :  { %v920_v46 = vpack.c.bf16 %v864_v42, %v862_v40  ;;  %v730_v47 = vpop.f32.mrb[48].mxu1 }
 0x1eb   :  { %v731_v49 = vadd.f32 %v730_v47, %v2002_v5  ;;  %v732_v51 = vpop.f32.mrb[49].mxu1 }
 0x1ec   :  { %v733_v24 = vadd.f32 %v732_v51, %v2006_v38  ;;  %v734_v25 = vpop.f32.mrb[50].mxu1  ;;  %1136 = vmatprep.mubr.bf16.mxu0 %v920_v46 }
 0x1ed   :  { %v735_v2 = vadd.f32 %v734_v25, %v2002_v5  ;;  %v736_v41 = vpop.f32.mrb[51].mxu1  ;;  %1137 = vmatmul.mubr.bf16.gmra.mrb[44].mxu0 %v919_v44  ;;  %v865_v11 = vmax.f32 %v731_v49, 0.0 }
 0x1ee   :  { %v737_v9 = vadd.f32 %v736_v41, %v2006_v38  ;;  %v866_v45 = vmax.f32 %v733_v24, 0.0 }
 0x1ef   :  { %v867_v43 = vmax.f32 %v735_v2, 0.0 }
 0x1f0   :  { %v868_v12 = vmax.f32 %v737_v9, 0.0 }
 0x1f1   :  { %v921_v0 = vpack.c.bf16 %v867_v43, %v865_v11 }
 0x1f2   :  { %v922_v48 = vpack.c.bf16 %v868_v12, %v866_v45  ;;  %v740_v50 = vpop.f32.mrb[52].mxu1 }
 0x1f3   :  { %v741_v52 = vadd.f32 %v740_v50, %v2002_v5  ;;  %v742_v21 = vpop.f32.mrb[53].mxu1 }
 0x1f4   :  { %v743_v53 = vadd.f32 %v742_v21, %v2006_v38  ;;  %v744_v54 = vpop.f32.mrb[54].mxu1  ;;  %1144 = vmatprep.mubr.bf16.mxu0 %v922_v48 }
 0x1f5   :  { %v745_v20 = vadd.f32 %v744_v54, %v2002_v5  ;;  %v746_v23 = vpop.f32.mrb[55].mxu1  ;;  %1145 = vmatmul.mubr.bf16.gmra.mrb[48].mxu0 %v921_v0  ;;  %v869_v56 = vmax.f32 %v741_v52, 0.0 }
 0x1f6   :  { %v747_v55 = vadd.f32 %v746_v23, %v2006_v38  ;;  %v870_v58 = vmax.f32 %v743_v53, 0.0 }
 0x1f7   :  { %v871_v57 = vmax.f32 %v745_v20, 0.0 }
 0x1f8   :  { %v872_v59 = vmax.f32 %v747_v55, 0.0 }
 0x1f9   :  { %v923_v60 = vpack.c.bf16 %v871_v57, %v869_v56 }
 0x1fa   :  { %v924_v61 = vpack.c.bf16 %v872_v59, %v870_v58  ;;  %v750_v62 = vpop.f32.mrb[56].mxu1 }
 0x1fb   :  { %v751_v63 = vadd.f32 %v750_v62, %v2002_v5  ;;  %v752_v1 = vpop.f32.mrb[57].mxu1 }
 0x1fc   :  { %v753_v3 = vadd.f32 %v752_v1, %v2006_v38  ;;  %v754_v4 = vpop.f32.mrb[58].mxu1  ;;  %1152 = vmatprep.mubr.bf16.mxu0 %v924_v61 }
 0x1fd   :  { %v755_v6 = vadd.f32 %v754_v4, %v2002_v5  ;;  %v756_v7 = vpop.f32.mrb[59].mxu1  ;;  %1153 = vmatmul.mubr.bf16.gmra.mrb[52].mxu0 %v923_v60  ;;  %v873_v10 = vmax.f32 %v751_v63, 0.0 }
 0x1fe   :  { %v757_v8 = vadd.f32 %v756_v7, %v2006_v38  ;;  %v874_v14 = vmax.f32 %v753_v3, 0.0 }
 0x1ff   :  { %v875_v13 = vmax.f32 %v755_v6, 0.0 }
 0x200   :  { %v876_v15 = vmax.f32 %v757_v8, 0.0 }
 0x201   :  { %v925_v16 = vpack.c.bf16 %v875_v13, %v873_v10 }
 0x202   :  { %v926_v17 = vpack.c.bf16 %v876_v15, %v874_v14  ;;  %v760_v18 = vpop.f32.mrb[60].mxu1 }
 0x203   :  { %v761_v19 = vadd.f32 %v760_v18, %v2002_v5  ;;  %v762_v22 = vpop.f32.mrb[61].mxu1 }
 0x204   :  { %v763_v26 = vadd.f32 %v762_v22, %v2006_v38  ;;  %v764_v27 = vpop.f32.mrb[62].mxu1  ;;  %1160 = vmatprep.mubr.bf16.mxu0 %v926_v17 }
 0x205   :  { %v765_v28 = vadd.f32 %v764_v27, %v2002_v5  ;;  %v766_v29 = vpop.f32.mrb[63].mxu1  ;;  %1161 = vmatmul.mubr.bf16.gmra.mrb[56].mxu0 %v925_v16  ;;  %v877_v31 = vmax.f32 %v761_v19, 0.0 }
 0x206   :  { %v767_v30 = vadd.f32 %v766_v29, %v2006_v38  ;;  %v878_v33 = vmax.f32 %v763_v26, 0.0 }
 0x207   :  { %v879_v32 = vmax.f32 %v765_v28, 0.0 }
 0x208   :  { %v880_v34 = vmax.f32 %v767_v30, 0.0 }
 0x209   :  { %v927_v35 = vpack.c.bf16 %v879_v32, %v877_v31 }
 0x20a   :  { %v928_v36 = vpack.c.bf16 %v880_v34, %v878_v33  ;;  %v770_v37 = vpop.f32.mrb[64].mxu1 }
 0x20b   :  { %v771_v39 = vadd.f32 %v770_v37, %v2002_v5  ;;  %v772_v40 = vpop.f32.mrb[65].mxu1 }
 0x20c   :  { %v773_v42 = vadd.f32 %v772_v40, %v2006_v38  ;;  %v774_v44 = vpop.f32.mrb[66].mxu1  ;;  %1168 = vmatprep.mubr.bf16.mxu0 %v928_v36 }
 0x20d   :  { %v775_v46 = vadd.f32 %v774_v44, %v2002_v5  ;;  %v776_v47 = vpop.f32.mrb[67].mxu1  ;;  %1169 = vmatmul.mubr.bf16.gmra.mrb[60].mxu0 %v927_v35  ;;  %v881_v51 = vmax.f32 %v771_v39, 0.0 }
 0x20e   :  { %v777_v49 = vadd.f32 %v776_v47, %v2006_v38  ;;  %v882_v25 = vmax.f32 %v773_v42, 0.0 }
 0x20f   :  { %v883_v24 = vmax.f32 %v775_v46, 0.0 }
 0x210   :  { %v884_v2 = vmax.f32 %v777_v49, 0.0 }
 0x211   :  { %v929_v41 = vpack.c.bf16 %v883_v24, %v881_v51 }
 0x212   :  { %v930_v9 = vpack.c.bf16 %v884_v2, %v882_v25  ;;  %v780_v11 = vpop.f32.mrb[68].mxu1 }
 0x213   :  { %v781_v43 = vadd.f32 %v780_v11, %v2002_v5  ;;  %v782_v45 = vpop.f32.mrb[69].mxu1 }
 0x214   :  { %v783_v12 = vadd.f32 %v782_v45, %v2006_v38  ;;  %v784_v0 = vpop.f32.mrb[70].mxu1  ;;  %1176 = vmatprep.mubr.bf16.mxu0 %v930_v9 }
 0x215   :  { %v785_v48 = vadd.f32 %v784_v0, %v2002_v5  ;;  %v786_v50 = vpop.f32.mrb[71].mxu1  ;;  %1177 = vmatmul.mubr.bf16.gmra.mrb[64].mxu0 %v929_v41  ;;  %v885_v21 = vmax.f32 %v781_v43, 0.0 }
 0x216   :  { %v787_v52 = vadd.f32 %v786_v50, %v2006_v38  ;;  %v886_v54 = vmax.f32 %v783_v12, 0.0 }
 0x217   :  { %v887_v53 = vmax.f32 %v785_v48, 0.0 }
 0x218   :  { %v888_v20 = vmax.f32 %v787_v52, 0.0 }
 0x219   :  { %v931_v23 = vpack.c.bf16 %v887_v53, %v885_v21 }
 0x21a   :  { %v932_v55 = vpack.c.bf16 %v888_v20, %v886_v54  ;;  %v790_v56 = vpop.f32.mrb[72].mxu1 }
 0x21b   :  { %v791_v57 = vadd.f32 %v790_v56, %v2002_v5  ;;  %v792_v58 = vpop.f32.mrb[73].mxu1 }
 0x21c   :  { %v793_v59 = vadd.f32 %v792_v58, %v2006_v38  ;;  %v794_v60 = vpop.f32.mrb[74].mxu1  ;;  %1184 = vmatprep.mubr.bf16.mxu0 %v932_v55 }
 0x21d   :  { %v795_v61 = vadd.f32 %v794_v60, %v2002_v5  ;;  %v796_v62 = vpop.f32.mrb[75].mxu1  ;;  %1185 = vmatmul.mubr.bf16.gmra.mrb[68].mxu0 %v931_v23  ;;  %v889_v1 = vmax.f32 %v791_v57, 0.0 }
 0x21e   :  { %v797_v63 = vadd.f32 %v796_v62, %v2006_v38  ;;  %v890_v4 = vmax.f32 %v793_v59, 0.0 }
 0x21f   :  { %v891_v3 = vmax.f32 %v795_v61, 0.0 }
 0x220   :  { %v892_v6 = vmax.f32 %v797_v63, 0.0 }
 0x221   :  { %v933_v7 = vpack.c.bf16 %v891_v3, %v889_v1 }
 0x222   :  { %v934_v8 = vpack.c.bf16 %v892_v6, %v890_v4  ;;  %v800_v10 = vpop.f32.mrb[76].mxu1 }
 0x223   :  { %v801_v13 = vadd.f32 %v800_v10, %v2002_v5  ;;  %v802_v14 = vpop.f32.mrb[77].mxu1 }
 0x224   :  { %v803_v15 = vadd.f32 %v802_v14, %v2006_v38  ;;  %v804_v16 = vpop.f32.mrb[78].mxu1  ;;  %1192 = vmatprep.mubr.bf16.mxu0 %v934_v8 }
 0x225   :  { %v805_v17 = vadd.f32 %v804_v16, %v2002_v5  ;;  %v806_v18 = vpop.f32.mrb[79].mxu1  ;;  %1193 = vmatmul.mubr.bf16.gmra.mrb[72].mxu0 %v933_v7  ;;  %v893_v22 = vmax.f32 %v801_v13, 0.0 }
 0x226   :  { %v807_v19 = vadd.f32 %v806_v18, %v2006_v38  ;;  %v894_v27 = vmax.f32 %v803_v15, 0.0 }
 0x227   :  { %v895_v26 = vmax.f32 %v805_v17, 0.0 }
 0x228   :  { %v896_v28 = vmax.f32 %v807_v19, 0.0 }
 0x229   :  { %v935_v29 = vpack.c.bf16 %v895_v26, %v893_v22  ;;  %v2075_v26 = vld [vmem:[%s2127_s6] ss:$0 sm:$0xff]  ;;  %s1597_s6 = smov [#allocation5]  }
 0x22a   :  { %v936_v30 = vpack.c.bf16 %v896_v28, %v894_v27  ;;  %v810_v31 = vpop.f32.mrb[80].mxu1  ;;  %s1278_s23 = sshll.u32 %s1597_s6, 4  ;;  %s1279_s23 = int_to_ptr.vmem [resolvable:$true] %s1278_s23 }
 0x22b   :  { %v811_v32 = vadd.f32 %v810_v31, %v2002_v5  ;;  %v812_v33 = vpop.f32.mrb[81].mxu1  ;;  %s1567_s1 = scalar_lea.vmem %s1279_s23, 4096  ;;  %p1572_p9 = scmp.lt.s32.totalorder %s1279_s23, %s1279_s23 }
 0x22c   :  { %v813_v34 = vadd.f32 %v812_v33, %v2006_v38  ;;  %v814_v35 = vpop.f32.mrb[82].mxu1  ;;  %1200 = vmatprep.mubr.bf16.mxu0 %v936_v30  ;;  %p1568_p8 = scmp.ne.s32.totalorder %s1279_s23, %s1567_s1  ;;  %p1573_p10 = scmp.lt.s32.totalorder %s1567_s1, %s1567_s1 }
 0x22d   :  { %v815_v36 = vadd.f32 %v814_v35, %v2002_v5  ;;  %v816_v37 = vpop.f32.mrb[83].mxu1  ;;  %1201 = vmatmul.mubr.bf16.gmra.mrb[76].mxu0 %v935_v29  ;;  %v897_v40 = vmax.f32 %v811_v32, 0.0 }
 0x22e   :  { %v817_v39 = vadd.f32 %v816_v37, %v2006_v38  ;;  %v898_v44 = vmax.f32 %v813_v34, 0.0  ;;  %p1574_p11 = por %p1573_p10, %p1572_p9 }
 0x22f   :  { %v899_v42 = vmax.f32 %v815_v36, 0.0 }
 0x230   :  { %v900_v46 = vmax.f32 %v817_v39, 0.0  ;;  %p1575_p12 = pnand %p1574_p11, %p1568_p8 }
 0x231   :  { %v937_v47 = vpack.c.bf16 %v899_v42, %v897_v40 }
 0x232   :  { %v938_v49 = vpack.c.bf16 %v900_v46, %v898_v44  ;;  %v820_v51 = vpop.f32.mrb[84].mxu1 }
 0x233   :  { %v821_v24 = vadd.f32 %v820_v51, %v2002_v5  ;;  %v822_v25 = vpop.f32.mrb[85].mxu1 }
 0x234   :  { %v823_v2 = vadd.f32 %v822_v25, %v2006_v38  ;;  %v824_v41 = vpop.f32.mrb[86].mxu1  ;;  %1208 = vmatprep.mubr.bf16.mxu0 %v938_v49 }
 0x235   :  { %v825_v9 = vadd.f32 %v824_v41, %v2002_v5  ;;  %v826_v11 = vpop.f32.mrb[87].mxu1  ;;  %1209 = vmatmul.mubr.bf16.gmra.mrb[80].mxu0 %v937_v47  ;;  %v901_v45 = vmax.f32 %v821_v24, 0.0 }
 0x236   :  { %v827_v43 = vadd.f32 %v826_v11, %v2006_v38  ;;  %v902_v0 = vmax.f32 %v823_v2, 0.0 }
 0x237   :  { %v903_v12 = vmax.f32 %v825_v9, 0.0 }
 0x238   :  { %v904_v48 = vmax.f32 %v827_v43, 0.0 }
 0x239   :  { %v939_v50 = vpack.c.bf16 %v903_v12, %v901_v45 }
 0x23a   :  { %v940_v52 = vpack.c.bf16 %v904_v48, %v902_v0  ;;  %v830_v21 = vpop.f32.mrb[88].mxu1 }
 0x23b   :  { %v831_v53 = vadd.f32 %v830_v21, %v2002_v5  ;;  %v832_v54 = vpop.f32.mrb[89].mxu1 }
 0x23c   :  { %v833_v20 = vadd.f32 %v832_v54, %v2006_v38  ;;  %v834_v23 = vpop.f32.mrb[90].mxu1  ;;  %1216 = vmatprep.mubr.bf16.mxu0 %v940_v52 }
 0x23d   :  { %v835_v55 = vadd.f32 %v834_v23, %v2002_v5  ;;  %v836_v56 = vpop.f32.mrb[91].mxu1  ;;  %1217 = vmatmul.mubr.bf16.gmra.mrb[84].mxu0 %v939_v50  ;;  %v905_v58 = vmax.f32 %v831_v53, 0.0 }
 0x23e   :  { %v837_v57 = vadd.f32 %v836_v56, %v2006_v38  ;;  %v906_v60 = vmax.f32 %v833_v20, 0.0 }
 0x23f   :  { %v907_v59 = vmax.f32 %v835_v55, 0.0 }
 0x240   :  { %v908_v61 = vmax.f32 %v837_v57, 0.0 }
 0x241   :  { %v941_v62 = vpack.c.bf16 %v907_v59, %v905_v58 }
 0x242   :  { %v942_v63 = vpack.c.bf16 %v908_v61, %v906_v60  ;;  %v840_v1 = vpop.f32.mrb[92].mxu1 }
 0x243   :  { %v841_v3 = vadd.f32 %v840_v1, %v2002_v5  ;;  %v842_v4 = vpop.f32.mrb[93].mxu1 }
 0x244   :  { %v843_v6 = vadd.f32 %v842_v4, %v2006_v38  ;;  %v844_v7 = vpop.f32.mrb[94].mxu1  ;;  %1224 = vmatprep.mubr.bf16.mxu0 %v942_v63 }
 0x245   :  { %v845_v8 = vadd.f32 %v844_v7, %v2002_v5  ;;  %v846_v10 = vpop.f32.mrb[95].mxu1  ;;  %1225 = vmatmul.mubr.bf16.gmra.mrb[88].mxu0 %v941_v62  ;;  %v909_v14 = vmax.f32 %v841_v3, 0.0 }
 0x246   :  { %v847_v13 = vadd.f32 %v846_v10, %v2006_v38  ;;  %v910_v16 = vmax.f32 %v843_v6, 0.0 }
 0x247   :  { %v911_v15 = vmax.f32 %v845_v8, 0.0 }
 0x248   :  { %v912_v17 = vmax.f32 %v847_v13, 0.0 }
 0x249   :  { %v943_v18 = vpack.c.bf16 %v911_v15, %v909_v14 }
 0x24a   :  { %v944_v19 = vpack.c.bf16 %v912_v17, %v910_v16 }
 0x24c   :  { %1232 = vmatprep.mubr.bf16.mxu0 %v944_v19 }
 0x24d   :  { %1233 = vmatmul.mubr.bf16.gmra.mrb[92].mxu0 %v943_v18 }
 0x2a8   :  { %v1373_v22 = vpop.f32.mrb[32].mxu0 }
 0x2a9   :  { %v1374_v27 = vpop.f32.mrb[33].mxu0 }
 0x2aa   :  { %v1375_v5 = vadd.f32 %v1374_v27, %v1373_v22  ;;  %v1376_v28 = vpop.f32.mrb[34].mxu0 }
 0x2ab   :  { %v1377_v29 = vpop.f32.mrb[35].mxu0 }
 0x2ac   :  { %v1115_v38 = vadd.f32 %v1375_v5, %v2075_v26  ;;  %v1378_v30 = vadd.f32 %v1377_v29, %v1376_v28 }
 0x2ae   :  { %1241 = vst [vmem:[#allocation5] sm:$0xff] %v1115_v38  ;;  %v1118_v31 = vadd.f32 %v1378_v30, %v2075_v26 }
 0x2b0   :  { %1242 = vst [vmem:[#allocation5 + $0x8] sm:$0xff] %v1118_v31  ;;  %v1379_v32 = vpop.f32.mrb[36].mxu0 }
 0x2b1   :  { %v1380_v33 = vpop.f32.mrb[37].mxu0 }
 0x2b2   :  { %v1381_v34 = vadd.f32 %v1380_v33, %v1379_v32  ;;  %v1382_v35 = vpop.f32.mrb[38].mxu0 }
 0x2b3   :  { %v1383_v36 = vpop.f32.mrb[39].mxu0 }
 0x2b4   :  { %v1123_v37 = vadd.f32 %v1381_v34, %v2075_v26  ;;  %v1384_v39 = vadd.f32 %v1383_v36, %v1382_v35 }
 0x2b6   :  { %1243 = vst [vmem:[#allocation5 + $0x10] sm:$0xff] %v1123_v37  ;;  %v1126_v40 = vadd.f32 %v1384_v39, %v2075_v26 }
 0x2b8   :  { %1244 = vst [vmem:[#allocation5 + $0x18] sm:$0xff] %v1126_v40  ;;  %v1385_v42 = vpop.f32.mrb[40].mxu0 }
 0x2b9   :  { %v1386_v44 = vpop.f32.mrb[41].mxu0 }
 0x2ba   :  { %v1387_v46 = vadd.f32 %v1386_v44, %v1385_v42  ;;  %v1388_v47 = vpop.f32.mrb[42].mxu0 }
 0x2bb   :  { %v1389_v49 = vpop.f32.mrb[43].mxu0 }
 0x2bc   :  { %v1131_v51 = vadd.f32 %v1387_v46, %v2075_v26  ;;  %v1390_v24 = vadd.f32 %v1389_v49, %v1388_v47 }
 0x2be   :  { %1245 = vst [vmem:[#allocation5 + $0x20] sm:$0xff] %v1131_v51  ;;  %v1134_v25 = vadd.f32 %v1390_v24, %v2075_v26 }
 0x2c0   :  { %1246 = vst [vmem:[#allocation5 + $0x28] sm:$0xff] %v1134_v25  ;;  %v1391_v2 = vpop.f32.mrb[44].mxu0 }
 0x2c1   :  { %v1392_v41 = vpop.f32.mrb[45].mxu0 }
 0x2c2   :  { %v1393_v9 = vadd.f32 %v1392_v41, %v1391_v2  ;;  %v1394_v11 = vpop.f32.mrb[46].mxu0 }
 0x2c3   :  { %v1395_v43 = vpop.f32.mrb[47].mxu0 }
 0x2c4   :  { %v1139_v45 = vadd.f32 %v1393_v9, %v2075_v26  ;;  %v1396_v12 = vadd.f32 %v1395_v43, %v1394_v11 }
 0x2c6   :  { %1247 = vst [vmem:[#allocation5 + $0x30] sm:$0xff] %v1139_v45  ;;  %v1142_v0 = vadd.f32 %v1396_v12, %v2075_v26 }
 0x2c8   :  { %1248 = vst [vmem:[#allocation5 + $0x38] sm:$0xff] %v1142_v0  ;;  %v1397_v48 = vpop.f32.mrb[48].mxu0 }
 0x2c9   :  { %v1398_v50 = vpop.f32.mrb[49].mxu0 }
 0x2ca   :  { %v1399_v52 = vadd.f32 %v1398_v50, %v1397_v48  ;;  %v1400_v21 = vpop.f32.mrb[50].mxu0 }
 0x2cb   :  { %v1401_v53 = vpop.f32.mrb[51].mxu0 }
 0x2cc   :  { %v1147_v54 = vadd.f32 %v1399_v52, %v2075_v26  ;;  %v1402_v20 = vadd.f32 %v1401_v53, %v1400_v21 }
 0x2ce   :  { %1249 = vst [vmem:[#allocation5 + $0x40] sm:$0xff] %v1147_v54  ;;  %v1150_v23 = vadd.f32 %v1402_v20, %v2075_v26 }
 0x2d0   :  { %1250 = vst [vmem:[#allocation5 + $0x48] sm:$0xff] %v1150_v23  ;;  %v1403_v55 = vpop.f32.mrb[52].mxu0 }
 0x2d1   :  { %v1404_v56 = vpop.f32.mrb[53].mxu0 }
 0x2d2   :  { %v1405_v57 = vadd.f32 %v1404_v56, %v1403_v55  ;;  %v1406_v58 = vpop.f32.mrb[54].mxu0 }
 0x2d3   :  { %v1407_v59 = vpop.f32.mrb[55].mxu0 }
 0x2d4   :  { %v1155_v60 = vadd.f32 %v1405_v57, %v2075_v26  ;;  %v1408_v61 = vadd.f32 %v1407_v59, %v1406_v58 }
 0x2d6   :  { %1251 = vst [vmem:[#allocation5 + $0x50] sm:$0xff] %v1155_v60  ;;  %v1158_v62 = vadd.f32 %v1408_v61, %v2075_v26 }
 0x2d8   :  { %1252 = vst [vmem:[#allocation5 + $0x58] sm:$0xff] %v1158_v62  ;;  %v1409_v63 = vpop.f32.mrb[56].mxu0 }
 0x2d9   :  { %v1410_v1 = vpop.f32.mrb[57].mxu0 }
 0x2da   :  { %v1411_v3 = vadd.f32 %v1410_v1, %v1409_v63  ;;  %v1412_v4 = vpop.f32.mrb[58].mxu0 }
 0x2db   :  { %v1413_v6 = vpop.f32.mrb[59].mxu0 }
 0x2dc   :  { %v1163_v7 = vadd.f32 %v1411_v3, %v2075_v26  ;;  %v1414_v8 = vadd.f32 %v1413_v6, %v1412_v4 }
 0x2de   :  { %1253 = vst [vmem:[#allocation5 + $0x60] sm:$0xff] %v1163_v7  ;;  %v1166_v10 = vadd.f32 %v1414_v8, %v2075_v26 }
 0x2e0   :  { %1254 = vst [vmem:[#allocation5 + $0x68] sm:$0xff] %v1166_v10  ;;  %v1415_v13 = vpop.f32.mrb[60].mxu0 }
 0x2e1   :  { %v1416_v14 = vpop.f32.mrb[61].mxu0 }
 0x2e2   :  { %v1417_v15 = vadd.f32 %v1416_v14, %v1415_v13  ;;  %v1418_v16 = vpop.f32.mrb[62].mxu0 }
 0x2e3   :  { %v1419_v17 = vpop.f32.mrb[63].mxu0 }
 0x2e4   :  { %v1171_v18 = vadd.f32 %v1417_v15, %v2075_v26  ;;  %v1420_v19 = vadd.f32 %v1419_v17, %v1418_v16 }
 0x2e6   :  { %1255 = vst [vmem:[#allocation5 + $0x70] sm:$0xff] %v1171_v18  ;;  %v1174_v22 = vadd.f32 %v1420_v19, %v2075_v26 }
 0x2e8   :  { %1256 = vst [vmem:[#allocation5 + $0x78] sm:$0xff] %v1174_v22  ;;  %v1421_v27 = vpop.f32.mrb[64].mxu0 }
 0x2e9   :  { %v1422_v5 = vpop.f32.mrb[65].mxu0 }
 0x2ea   :  { %v1423_v28 = vadd.f32 %v1422_v5, %v1421_v27  ;;  %v1424_v29 = vpop.f32.mrb[66].mxu0 }
 0x2eb   :  { %v1425_v38 = vpop.f32.mrb[67].mxu0 }
 0x2ec   :  { %v1179_v30 = vadd.f32 %v1423_v28, %v2075_v26  ;;  %v1426_v31 = vadd.f32 %v1425_v38, %v1424_v29 }
 0x2ee   :  { %1257 = vst [vmem:[#allocation5 + $0x80] sm:$0xff] %v1179_v30  ;;  %v1182_v32 = vadd.f32 %v1426_v31, %v2075_v26 }
 0x2f0   :  { %1258 = vst [vmem:[#allocation5 + $0x88] sm:$0xff] %v1182_v32  ;;  %v1427_v33 = vpop.f32.mrb[68].mxu0 }
 0x2f1   :  { %v1428_v34 = vpop.f32.mrb[69].mxu0 }
 0x2f2   :  { %v1429_v35 = vadd.f32 %v1428_v34, %v1427_v33  ;;  %v1430_v36 = vpop.f32.mrb[70].mxu0 }
 0x2f3   :  { %v1431_v37 = vpop.f32.mrb[71].mxu0 }
 0x2f4   :  { %v1187_v39 = vadd.f32 %v1429_v35, %v2075_v26  ;;  %v1432_v40 = vadd.f32 %v1431_v37, %v1430_v36 }
 0x2f6   :  { %1259 = vst [vmem:[#allocation5 + $0x90] sm:$0xff] %v1187_v39  ;;  %v1190_v42 = vadd.f32 %v1432_v40, %v2075_v26 }
 0x2f8   :  { %1260 = vst [vmem:[#allocation5 + $0x98] sm:$0xff] %v1190_v42  ;;  %v1433_v44 = vpop.f32.mrb[72].mxu0 }
 0x2f9   :  { %v1434_v46 = vpop.f32.mrb[73].mxu0 }
 0x2fa   :  { %v1435_v47 = vadd.f32 %v1434_v46, %v1433_v44  ;;  %v1436_v49 = vpop.f32.mrb[74].mxu0 }
 0x2fb   :  { %v1437_v51 = vpop.f32.mrb[75].mxu0 }
 0x2fc   :  { %v1195_v24 = vadd.f32 %v1435_v47, %v2075_v26  ;;  %v1438_v25 = vadd.f32 %v1437_v51, %v1436_v49 }
 0x2fe   :  { %1261 = vst [vmem:[#allocation5 + $0xa0] sm:$0xff] %v1195_v24  ;;  %v1198_v2 = vadd.f32 %v1438_v25, %v2075_v26 }
 0x300   :  { %1262 = vst [vmem:[#allocation5 + $0xa8] sm:$0xff] %v1198_v2  ;;  %v1439_v41 = vpop.f32.mrb[76].mxu0 }
 0x301   :  { %v1440_v9 = vpop.f32.mrb[77].mxu0 }
 0x302   :  { %v1441_v11 = vadd.f32 %v1440_v9, %v1439_v41  ;;  %v1442_v43 = vpop.f32.mrb[78].mxu0 }
 0x303   :  { %v1443_v45 = vpop.f32.mrb[79].mxu0 }
 0x304   :  { %v1203_v12 = vadd.f32 %v1441_v11, %v2075_v26  ;;  %v1444_v0 = vadd.f32 %v1443_v45, %v1442_v43 }
 0x306   :  { %1263 = vst [vmem:[#allocation5 + $0xb0] sm:$0xff] %v1203_v12  ;;  %v1206_v48 = vadd.f32 %v1444_v0, %v2075_v26 }
 0x308   :  { %1264 = vst [vmem:[#allocation5 + $0xb8] sm:$0xff] %v1206_v48  ;;  %v1445_v50 = vpop.f32.mrb[80].mxu0 }
 0x309   :  { %v1446_v52 = vpop.f32.mrb[81].mxu0 }
 0x30a   :  { %v1447_v21 = vadd.f32 %v1446_v52, %v1445_v50  ;;  %v1448_v53 = vpop.f32.mrb[82].mxu0 }
 0x30b   :  { %v1449_v54 = vpop.f32.mrb[83].mxu0 }
 0x30c   :  { %v1211_v20 = vadd.f32 %v1447_v21, %v2075_v26  ;;  %v1450_v23 = vadd.f32 %v1449_v54, %v1448_v53 }
 0x30e   :  { %1265 = vst [vmem:[#allocation5 + $0xc0] sm:$0xff] %v1211_v20  ;;  %v1214_v55 = vadd.f32 %v1450_v23, %v2075_v26 }
 0x310   :  { %1266 = vst [vmem:[#allocation5 + $0xc8] sm:$0xff] %v1214_v55  ;;  %v1451_v56 = vpop.f32.mrb[84].mxu0 }
 0x311   :  { %v1452_v57 = vpop.f32.mrb[85].mxu0 }
 0x312   :  { %v1453_v58 = vadd.f32 %v1452_v57, %v1451_v56  ;;  %v1454_v59 = vpop.f32.mrb[86].mxu0 }
 0x313   :  { %v1455_v60 = vpop.f32.mrb[87].mxu0 }
 0x314   :  { %v1219_v61 = vadd.f32 %v1453_v58, %v2075_v26  ;;  %v1456_v62 = vadd.f32 %v1455_v60, %v1454_v59 }
 0x316   :  { %1267 = vst [vmem:[#allocation5 + $0xd0] sm:$0xff] %v1219_v61  ;;  %v1222_v63 = vadd.f32 %v1456_v62, %v2075_v26 }
 0x318   :  { %1268 = vst [vmem:[#allocation5 + $0xd8] sm:$0xff] %v1222_v63  ;;  %v1457_v1 = vpop.f32.mrb[88].mxu0 }
 0x319   :  { %v1458_v3 = vpop.f32.mrb[89].mxu0 }
 0x31a   :  { %v1459_v4 = vadd.f32 %v1458_v3, %v1457_v1  ;;  %v1460_v6 = vpop.f32.mrb[90].mxu0 }
 0x31b   :  { %v1461_v7 = vpop.f32.mrb[91].mxu0 }
 0x31c   :  { %v1227_v8 = vadd.f32 %v1459_v4, %v2075_v26  ;;  %v1462_v10 = vadd.f32 %v1461_v7, %v1460_v6 }
 0x31e   :  { %1269 = vst [vmem:[#allocation5 + $0xe0] sm:$0xff] %v1227_v8  ;;  %v1230_v13 = vadd.f32 %v1462_v10, %v2075_v26 }
 0x320   :  { %1270 = vst [vmem:[#allocation5 + $0xe8] sm:$0xff] %v1230_v13  ;;  %v1463_v14 = vpop.f32.mrb[92].mxu0 }
 0x321   :  { %v1464_v15 = vpop.f32.mrb[93].mxu0 }
 0x322   :  { %v1465_v16 = vadd.f32 %v1464_v15, %v1463_v14  ;;  %v1466_v17 = vpop.f32.mrb[94].mxu0 }
 0x323   :  { %v1467_v18 = vpop.f32.mrb[95].mxu0 }
 0x324   :  { %v1235_v19 = vadd.f32 %v1465_v16, %v2075_v26  ;;  %v1468_v22 = vadd.f32 %v1467_v18, %v1466_v17 }
 0x326   :  { %1271 = vst [vmem:[#allocation5 + $0xf0] sm:$0xff] %v1235_v19  ;;  %v1238_v27 = vadd.f32 %v1468_v22, %v2075_v26 }
 0x328   :  { %1272 = vst [vmem:[#allocation5 + $0xf8] sm:$0xff] %v1238_v27 }
 0x329   :  { %1578 = shalt.err (!%p1575_p12)
}
 0x32a   :  { %s1579_s26 = scalar_lea.hbm %s2128_s7, 4096 }
 0x32b   :  { %p1580_p13 = scmp.ne.s32.totalorder %s2128_s7, %s1579_s26  ;;  %p1583_p0 = scmp.lt.u32.totalorder %s1579_s26, %s2128_s7 }
 0x32d   :  { %p1585_p1 = pnand %p1583_p0, %p1580_p13 }
 0x32f   :  { %1588 = shalt.err (!%p1585_p1)
}
 0x330   :  { %s1598_s8 = smov 128   ;;  %s1599_s9 = smov 8  }
 0x331   :  { %1284 = dma.vmem_to_hbm [thread:$0]  %s1279_s23, 4096, %s2128_s7, [#allocation4], %s1598_s8, %s1598_s8, %s1599_s9  }
 0x332   :  { %1591 = dma.done.wait [#allocation4], 4096  }
 0x333   :  { %1592 = vsyncadd [#allocation4], 4294963200 }
 0x334   :  { %1288 = vsyncpa [#allocation3], 1 }
 0x335   :  { %1289 = vsyncpa [#allocation4], 1 }

</bundles_post_ra>
